<compile_context>
chip_gen: v5e
topology: v5e:2x2
jax: 0.10.0
libtpu: 0.0.40
codegen_flags: <defaults>
</compile_context>

<pallas_src>
import jax
import jax.numpy as jnp
from jax.experimental import pallas as pl
from jax.experimental.pallas import tpu as pltpu

HIDDEN = 64


def _ceil_to(x, m):
    return -(-x // m) * m


def _vmem_bytes(Tc, Bt, D_in, H):
    """Rough VMEM footprint (tiles are sublane/lane padded to (8, 128))."""
    lane = lambda n: _ceil_to(max(n, 1), 128)
    sub = lambda n: _ceil_to(max(n, 1), 8)
    x_io = 2 * Tc * sub(Bt) * lane(D_in) * 2            # bf16 x, double buffered
    out_io = 2 * sub(Tc) * lane(Bt) * 4                 # f32 out, double buffered
    w_io = 2 * (sub(D_in) * lane(4 * H) * 2             # W_ih^T  bf16
                + sub(H) * lane(4 * H) * 2              # W_hh^T  bf16
                + sub(1) * lane(4 * H) * 4              # bias    f32
                + sub(1) * lane(H) * 4                  # W_out   f32
                + sub(1) * lane(1) * 4)                 # b_out   f32
    scratch = (Tc * sub(Bt) * lane(4 * H) * 4           # xg      f32
               + Tc * sub(Bt) * lane(H) * 2             # hall    bf16
               + sub(Bt) * lane(H) * 2                  # h       bf16
               + sub(Bt) * lane(H) * 4)                 # c       f32
    return x_io + out_io + w_io + scratch


def _to_ifog(w):
    """Reorder PyTorch LSTM gate blocks along axis 0: (i, f, g, o) -> (i, f, o, g)."""
    i, f, g, o = jnp.split(w, 4, axis=0)
    return jnp.concatenate([i, f, o, g], axis=0)


def _lstm_chunk_kernel(x_ref, wih_ref, whh_ref, b_ref, wout_ref, bout_ref,
                       out_ref, h_scr, c_scr, xg_scr, hall_scr):
    """One grid step == one (batch-tile, time-chunk).

    x_ref    : (Tc, Bt, D_in)  time-major input chunk (bf16)
    wih_ref  : (D_in, 4H)      W_ih^T, gate order (i,f,o,g) (bf16)
    whh_ref  : (H, 4H)         W_hh^T, gate order (i,f,o,g) (bf16)
    b_ref    : (1, 4H)         b_ih + b_hh, gate order (i,f,o,g) (f32)
    wout_ref : (1, H)          output Linear weight (f32)
    bout_ref : (1, 1)          output Linear bias (f32)
    out_ref  : (Tc, Bt)        per-timestep scalar outputs for this chunk
    h_scr    : (Bt, H)  bf16   hidden state, persists across time chunks
    c_scr    : (Bt, H)  f32    cell state, persists across time chunks
    xg_scr   : (Tc, Bt, 4H)    hoisted input projection for the chunk (f32)
    hall_scr : (Tc, Bt, H) bf16 hidden states of the chunk (for output proj)
    """
    Tc, Bt, D_in = x_ref.shape
    H = whh_ref.shape[0]
    t_blk = pl.program_id(1)        # time-chunk axis (innermost, "arbitrary")

    @pl.when(t_blk == 0)
    def _():
        h_scr[...] = jnp.zeros_like(h_scr)
        c_scr[...] = jnp.zeros_like(c_scr)

    # ---- Phase 1: input projection, fused into ONE big MXU matmul. -------
    # (Tc, Bt, D_in) -> (Tc*Bt, D_in); collapse of leading dims is layout
    # preserving, so this is a single matmul + one dense store.
    x2d = x_ref[...].reshape(Tc * Bt, D_in)
    xg = jnp.dot(x2d, wih_ref[...],
                 preferred_element_type=jnp.float32) + b_ref[...]
    xg_scr[...] = xg.reshape(Tc, Bt, 4 * H)

    # ---- Phase 2: serial LSTM recurrence (one small matmul per step). ----
    # Gate order is (i, f, o, g): sigmoid on the first 3H lanes only.
    whh = whh_ref[...]

    def step(t, carry):
        h_prev, c_prev = carry                         # bf16, f32
        gates = xg_scr[t] + jnp.dot(h_prev, whh,
                                    preferred_element_type=jnp.float32)
        sig = jax.nn.sigmoid(gates[:, :3 * H])         # 3H lanes of EUP work
        i_g = sig[:, 0 * H:1 * H]
        f_g = sig[:, 1 * H:2 * H]
        o_g = sig[:, 2 * H:3 * H]
        g_g = jnp.tanh(gates[:, 3 * H:4 * H])
        c_new = f_g * c_prev + i_g * g_g
        h_new = (o_g * jnp.tanh(c_new)).astype(jnp.bfloat16)
        hall_scr[t] = h_new
        return h_new, c_new

    h_last, c_last = jax.lax.fori_loop(
        0, Tc, step, (h_scr[...], c_scr[...]), unroll=min(8, Tc))
    h_scr[...] = h_last
    c_scr[...] = c_last

    # ---- Phase 3: Linear(H -> 1) on the whole chunk, one dense store. ----
    prod = hall_scr[...].astype(jnp.float32) * wout_ref[...]    # (Tc, Bt, H)
    out_tb = jnp.sum(prod, axis=-1) + bout_ref[...]             # (Tc, Bt)
    out_ref[...] = out_tb.astype(out_ref.dtype)


@jax.jit
def rnn_forward(x, w_ih, w_hh, b_ih, b_hh, w_out, b_out):
    """x: (B, T, D_in) -> (B, T, 1), same semantics as the PyTorch module."""
    B, T, D_in = x.shape
    H = HIDDEN

    # Batch tile: multiple of 8 sublanes, <=128.  This policy keeps the
    # (8,128) output-block constraint satisfied (Bt == B_pad or Bt == 128).
    Bt = min(_ceil_to(B, 8), 128)
    B_pad = _ceil_to(B, Bt)
    # TODO(synk): on v7x (2 TensorCores) batches of 9..128 still map to a
    # single "parallel" batch tile; splitting them needs a tile-major output
    # layout to stay within the (8,128) block rules.

    # Time chunk: multiple of 8, default 64, shrunk if the VMEM footprint
    # would get large (huge D_in).
    Tc = 64 if T >= 64 else _ceil_to(T, 8)
    while Tc > 8 and _vmem_bytes(Tc, Bt, D_in, H) > (40 << 20):
        Tc = max(8, _ceil_to(Tc // 2, 8))
    T_pad = _ceil_to(T, Tc)
    vmem_limit = int(min(max(_vmem_bytes(Tc, Bt, D_in, H) + (8 << 20),
                             32 << 20), 48 << 20))

    # Zero-pad; padded rows / trailing timesteps are sliced off below.
    # x is cast to bf16 once here (halves input DMA + x double buffers).
    x_p = jnp.pad(x, ((0, B_pad - B), (0, T_pad - T), (0, 0)))
    x_tm = jnp.transpose(x_p, (1, 0, 2)).astype(jnp.bfloat16)  # (T_pad,B_pad,D_in)
    # TODO(synk): for tiny D_in the (Tc, Bt, D_in) VMEM tile is lane-padded to
    # 128; a (Tc, D_in, Bt) lane-dense layout would shrink the x buffers but
    # needs a rank-3 contraction in-kernel.

    # Gate reorder (i,f,g,o) -> (i,f,o,g) so sigmoid only covers 3H lanes.
    wih_t = jnp.transpose(_to_ifog(w_ih)).astype(jnp.bfloat16)   # (D_in, 4H)
    whh_t = jnp.transpose(_to_ifog(w_hh)).astype(jnp.bfloat16)   # (H, 4H)
    b = _to_ifog(b_ih + b_hh).reshape(1, 4 * H).astype(jnp.float32)
    wout = w_out.reshape(1, H).astype(jnp.float32)
    bout = b_out.reshape(1, 1).astype(jnp.float32)

    out_tm = pl.pallas_call(
        _lstm_chunk_kernel,
        out_shape=jax.ShapeDtypeStruct((T_pad, B_pad), jnp.float32),
        grid_spec=pltpu.PrefetchScalarGridSpec(
            num_scalar_prefetch=0,
            grid=(B_pad // Bt, T_pad // Tc),
            in_specs=[
                pl.BlockSpec((Tc, Bt, D_in), lambda b_, t: (t, b_, 0)),  # x
                pl.BlockSpec((D_in, 4 * H), lambda b_, t: (0, 0)),       # W_ih^T
                pl.BlockSpec((H, 4 * H), lambda b_, t: (0, 0)),          # W_hh^T
                pl.BlockSpec((1, 4 * H), lambda b_, t: (0, 0)),          # bias
                pl.BlockSpec((1, H), lambda b_, t: (0, 0)),              # W_out
                pl.BlockSpec((1, 1), lambda b_, t: (0, 0)),              # b_out
            ],
            out_specs=pl.BlockSpec((Tc, Bt), lambda b_, t: (t, b_)),
            scratch_shapes=[
                pltpu.VMEM((Bt, H), jnp.bfloat16),          # h state
                pltpu.VMEM((Bt, H), jnp.float32),           # c state
                pltpu.VMEM((Tc, Bt, 4 * H), jnp.float32),   # hoisted x proj
                pltpu.VMEM((Tc, Bt, H), jnp.bfloat16),      # h per timestep
            ],
        ),
        compiler_params=pltpu.CompilerParams(
            dimension_semantics=("parallel", "arbitrary"),  # batch ||, time seq
            vmem_limit_bytes=vmem_limit,
        ),
    )(x_tm, wih_t, whh_t, b, wout, bout)

    out = out_tm[:T, :B]                               # (T, B)
    return jnp.transpose(out)[..., None]               # (B, T, 1)


def _lstm_reference(x, w_ih, w_hh, b_ih, b_hh, w_out, b_out):
    """Pure f32 JAX reference with PyTorch LSTM semantics (gate order i,f,g,o)."""
    B, T, _ = x.shape
    H = HIDDEN
    h = jnp.zeros((B, H), jnp.float32)
    c = jnp.zeros((B, H), jnp.float32)
    outs = []
    for t in range(T):
        gates = x[:, t, :] @ w_ih.T + b_ih + h @ w_hh.T + b_hh
        i = jax.nn.sigmoid(gates[:, 0 * H:1 * H])
        f = jax.nn.sigmoid(gates[:, 1 * H:2 * H])
        g = jnp.tanh(gates[:, 2 * H:3 * H])
        o = jax.nn.sigmoid(gates[:, 3 * H:4 * H])
        c = f * c + i * g
        h = o * jnp.tanh(c)
        outs.append(h @ w_out.T + b_out)
    return jnp.stack(outs, axis=1)                     # (B, T, 1)


def _init_params(key, input_size, hidden):
    """Deterministic init mimicking PyTorch's uniform(-1/sqrt(H), 1/sqrt(H))."""
    k = 1.0 / jnp.sqrt(jnp.float32(hidden))
    keys = jax.random.split(key, 6)
    w_ih = jax.random.uniform(keys[0], (4 * hidden, input_size),
                              jnp.float32, -k, k)
    w_hh = jax.random.uniform(keys[1], (4 * hidden, hidden),
                              jnp.float32, -k, k)
    b_ih = jax.random.uniform(keys[2], (4 * hidden,), jnp.float32, -k, k)
    b_hh = jax.random.uniform(keys[3], (4 * hidden,), jnp.float32, -k, k)
    w_out = jax.random.uniform(keys[4], (1, hidden), jnp.float32, -k, k)
    b_out = jax.random.uniform(keys[5], (1,), jnp.float32, -k, k)
    return w_ih, w_hh, b_ih, b_hh, w_out, b_out


if __name__ == "__main__":
    B, T, D_in = 2, 8, 4

    key = jax.random.PRNGKey(0)
    kx, kp = jax.random.split(key)
    x = jax.random.normal(kx, (B, T, D_in), jnp.float32)
    params = _init_params(kp, D_in, HIDDEN)

    out = rnn_forward(x, *params)
    jax.block_until_ready(out)

    assert out.shape == (B, T, 1), out.shape
    ref = _lstm_reference(x, *params)
    err = float(jnp.max(jnp.abs(out - ref)))
    assert err < 5e-2, f"max abs error vs f32 reference: {err}"
    print("KERNEL_OK")
</pallas_src>

<mosaic_0001>
module attributes {stable_mosaic.version = 11 : i64} {
  func.func @_lstm_chunk_kernel(%arg0: i32, %arg1: i32, %arg2: memref<8x8x4xbf16, #tpu.memory_space<vmem>>, %arg3: memref<4x256xbf16, #tpu.memory_space<vmem>>, %arg4: memref<64x256xbf16, #tpu.memory_space<vmem>>, %arg5: memref<1x256xf32, #tpu.memory_space<vmem>>, %arg6: memref<1x64xf32, #tpu.memory_space<vmem>>, %arg7: memref<1x1xf32, #tpu.memory_space<vmem>>, %arg8: memref<8x8xf32, #tpu.memory_space<vmem>>, %arg9: memref<8x64xbf16, #tpu.memory_space<vmem>>, %arg10: memref<8x64xf32, #tpu.memory_space<vmem>>, %arg11: memref<8x8x256xf32, #tpu.memory_space<vmem>>, %arg12: memref<8x8x64xbf16, #tpu.memory_space<vmem>>) attributes {dimension_semantics = [#tpu.dimension_semantics<parallel>, #tpu.dimension_semantics<arbitrary>], iteration_bounds = array<i64: 1, 1>, scalar_prefetch = 0 : i64, scratch_operands = 4 : i64, tpu.core_type = #tpu.core_type<tc>, window_params = [{transform_indices = @transform_0, window_bounds = array<i64: 8, 8, 4>}, {pipeline_mode = #tpu.pipeline_mode<synchronous>, transform_indices = @transform_1, window_bounds = array<i64: 4, 256>}, {pipeline_mode = #tpu.pipeline_mode<synchronous>, transform_indices = @transform_2, window_bounds = array<i64: 64, 256>}, {pipeline_mode = #tpu.pipeline_mode<synchronous>, transform_indices = @transform_3, window_bounds = array<i64: 1, 256>}, {pipeline_mode = #tpu.pipeline_mode<synchronous>, transform_indices = @transform_4, window_bounds = array<i64: 1, 64>}, {pipeline_mode = #tpu.pipeline_mode<synchronous>, transform_indices = @transform_5, window_bounds = array<i64: 1, 1>}, {transform_indices = @transform_6, window_bounds = array<i64: 8, 8>}]} {
    %c0_i32 = arith.constant 0 : i32
    %0 = arith.cmpi eq, %arg1, %c0_i32 : i32
    %1 = arith.extui %0 : i1 to i32
    %c0_i32_0 = arith.constant 0 : i32
    %2 = arith.cmpi ne, %1, %c0_i32_0 : i32
    scf.if %2 {
      %cst_79 = arith.constant 0.000000e+00 : bf16
      %236 = vector.broadcast %cst_79 : bf16 to vector<8x64xbf16>
      %c0_80 = arith.constant 0 : index
      %c0_81 = arith.constant 0 : index
      %237 = vector.load %arg9[%c0_80, %c0_81] : memref<8x64xbf16, #tpu.memory_space<vmem>>, vector<8x64xbf16>
      tpu.vector_store %arg9[%c0_80, %c0_81], %236 {strides = array<i32>} : memref<8x64xbf16, #tpu.memory_space<vmem>>, vector<8x64xbf16>,
      %cst_82 = arith.constant 0.000000e+00 : f32
      %238 = vector.broadcast %cst_82 : f32 to vector<8x64xf32>
      %c0_83 = arith.constant 0 : index
      %c0_84 = arith.constant 0 : index
      %239 = vector.load %arg10[%c0_83, %c0_84] : memref<8x64xf32, #tpu.memory_space<vmem>>, vector<8x64xf32>
      tpu.vector_store %arg10[%c0_83, %c0_84], %238 {strides = array<i32>} : memref<8x64xf32, #tpu.memory_space<vmem>>, vector<8x64xf32>,
    } else {
    }
    %c0 = arith.constant 0 : index
    %c0_1 = arith.constant 0 : index
    %c0_2 = arith.constant 0 : index
    %3 = vector.load %arg2[%c0, %c0_1, %c0_2] : memref<8x8x4xbf16, #tpu.memory_space<vmem>>, vector<8x8x4xbf16>
    %4 = vector.shape_cast %3 : vector<8x8x4xbf16> to vector<64x4xbf16>
    %c0_3 = arith.constant 0 : index
    %c0_4 = arith.constant 0 : index
    %5 = vector.load %arg3[%c0_3, %c0_4] : memref<4x256xbf16, #tpu.memory_space<vmem>>, vector<4x256xbf16>
    %cst = arith.constant dense<0.000000e+00> : vector<64x256xf32>
    %6 = tpu.matmul %4, %5, %cst {dimension_numbers = #tpu.dot_dimension_numbers<[1], [0], [0], [1], [0, 0, 1, 1], [], []>} : vector<64x4xbf16>, vector<4x256xbf16>, vector<64x256xf32> -> vector<64x256xf32>
    %c0_5 = arith.constant 0 : index
    %c0_6 = arith.constant 0 : index
    %7 = vector.load %arg5[%c0_5, %c0_6] : memref<1x256xf32, #tpu.memory_space<vmem>>, vector<1x256xf32>
    %8 = vector.broadcast %7 : vector<1x256xf32> to vector<64x256xf32>
    %9 = arith.addf %6, %8 : vector<64x256xf32>
    %10 = vector.shape_cast %9 : vector<64x256xf32> to vector<8x8x256xf32>
    %c0_7 = arith.constant 0 : index
    %c0_8 = arith.constant 0 : index
    %c0_9 = arith.constant 0 : index
    %11 = vector.load %arg11[%c0_7, %c0_8, %c0_9] : memref<8x8x256xf32, #tpu.memory_space<vmem>>, vector<8x8x256xf32>
    tpu.vector_store %arg11[%c0_7, %c0_8, %c0_9], %10 {strides = array<i32>} : memref<8x8x256xf32, #tpu.memory_space<vmem>>, vector<8x8x256xf32>,
    %c0_10 = arith.constant 0 : index
    %c0_11 = arith.constant 0 : index
    %12 = vector.load %arg4[%c0_10, %c0_11] : memref<64x256xbf16, #tpu.memory_space<vmem>>, vector<64x256xbf16>
    %c0_12 = arith.constant 0 : index
    %c0_13 = arith.constant 0 : index
    %13 = vector.load %arg9[%c0_12, %c0_13] : memref<8x64xbf16, #tpu.memory_space<vmem>>, vector<8x64xbf16>
    %c0_14 = arith.constant 0 : index
    %c0_15 = arith.constant 0 : index
    %14 = vector.load %arg10[%c0_14, %c0_15] : memref<8x64xf32, #tpu.memory_space<vmem>>, vector<8x64xf32>
    %c0_i32_16 = arith.constant 0 : i32
    %15 = arith.index_cast %c0_i32_16 : i32 to index
    %c0_17 = arith.constant 0 : index
    %c0_18 = arith.constant 0 : index
    %16 = vector.load %arg11[%15, %c0_17, %c0_18] : memref<8x8x256xf32, #tpu.memory_space<vmem>>, vector<1x8x256xf32>
    %17 = vector.shape_cast %16 : vector<1x8x256xf32> to vector<8x256xf32>
    %cst_19 = arith.constant dense<0.000000e+00> : vector<8x256xf32>
    %18 = tpu.matmul %13, %12, %cst_19 {dimension_numbers = #tpu.dot_dimension_numbers<[1], [0], [0], [1], [0, 0, 1, 1], [], []>} : vector<8x64xbf16>, vector<64x256xbf16>, vector<8x256xf32> -> vector<8x256xf32>
    %19 = arith.addf %17, %18 : vector<8x256xf32>
    %20 = vector.extract_strided_slice %19 {offsets = [0, 0], sizes = [8, 192], strides = [1, 1]} : vector<8x256xf32> to vector<8x192xf32>
    %21 = arith.negf %20 : vector<8x192xf32>
    %22 = math.exp %21 : vector<8x192xf32>
    %cst_20 = arith.constant 1.000000e+00 : f32
    %23 = vector.broadcast %cst_20 : f32 to vector<8x192xf32>
    %24 = arith.addf %23, %22 : vector<8x192xf32>
    %25 = arith.divf %23, %24 : vector<8x192xf32>
    %26 = vector.extract_strided_slice %25 {offsets = [0, 0], sizes = [8, 64], strides = [1, 1]} : vector<8x192xf32> to vector<8x64xf32>
    %27 = vector.extract_strided_slice %25 {offsets = [0, 64], sizes = [8, 64], strides = [1, 1]} : vector<8x192xf32> to vector<8x64xf32>
    %28 = vector.extract_strided_slice %25 {offsets = [0, 128], sizes = [8, 64], strides = [1, 1]} : vector<8x192xf32> to vector<8x64xf32>
    %29 = vector.extract_strided_slice %19 {offsets = [0, 192], sizes = [8, 64], strides = [1, 1]} : vector<8x256xf32> to vector<8x64xf32>
    %30 = math.tanh %29 : vector<8x64xf32>
    %31 = arith.mulf %27, %14 : vector<8x64xf32>
    %32 = arith.mulf %26, %30 : vector<8x64xf32>
    %33 = arith.addf %31, %32 : vector<8x64xf32>
    %34 = math.tanh %33 : vector<8x64xf32>
    %35 = arith.mulf %28, %34 : vector<8x64xf32>
    %36 = arith.truncf %35 : vector<8x64xf32> to vector<8x64xbf16>
    %37 = arith.index_cast %c0_i32_16 : i32 to index
    %c0_21 = arith.constant 0 : index
    %c0_22 = arith.constant 0 : index
    %38 = vector.load %arg12[%37, %c0_21, %c0_22] : memref<8x8x64xbf16, #tpu.memory_space<vmem>>, vector<1x8x64xbf16>
    %39 = vector.shape_cast %38 : vector<1x8x64xbf16> to vector<8x64xbf16>
    %40 = vector.shape_cast %36 : vector<8x64xbf16> to vector<1x8x64xbf16>
    tpu.vector_store %arg12[%37, %c0_21, %c0_22], %40 {strides = array<i32>} : memref<8x8x64xbf16, #tpu.memory_space<vmem>>, vector<1x8x64xbf16>,
    %c1_i32 = arith.constant 1 : i32
    %41 = arith.index_cast %c1_i32 : i32 to index
    %c0_23 = arith.constant 0 : index
    %c0_24 = arith.constant 0 : index
    %42 = vector.load %arg11[%41, %c0_23, %c0_24] : memref<8x8x256xf32, #tpu.memory_space<vmem>>, vector<1x8x256xf32>
    %43 = vector.shape_cast %42 : vector<1x8x256xf32> to vector<8x256xf32>
    %cst_25 = arith.constant dense<0.000000e+00> : vector<8x256xf32>
    %44 = tpu.matmul %36, %12, %cst_25 {dimension_numbers = #tpu.dot_dimension_numbers<[1], [0], [0], [1], [0, 0, 1, 1], [], []>} : vector<8x64xbf16>, vector<64x256xbf16>, vector<8x256xf32> -> vector<8x256xf32>
    %45 = arith.addf %43, %44 : vector<8x256xf32>
    %46 = vector.extract_strided_slice %45 {offsets = [0, 0], sizes = [8, 192], strides = [1, 1]} : vector<8x256xf32> to vector<8x192xf32>
    %47 = arith.negf %46 : vector<8x192xf32>
    %48 = math.exp %47 : vector<8x192xf32>
    %cst_26 = arith.constant 1.000000e+00 : f32
    %49 = vector.broadcast %cst_26 : f32 to vector<8x192xf32>
    %50 = arith.addf %49, %48 : vector<8x192xf32>
    %51 = arith.divf %49, %50 : vector<8x192xf32>
    %52 = vector.extract_strided_slice %51 {offsets = [0, 0], sizes = [8, 64], strides = [1, 1]} : vector<8x192xf32> to vector<8x64xf32>
    %53 = vector.extract_strided_slice %51 {offsets = [0, 64], sizes = [8, 64], strides = [1, 1]} : vector<8x192xf32> to vector<8x64xf32>
    %54 = vector.extract_strided_slice %51 {offsets = [0, 128], sizes = [8, 64], strides = [1, 1]} : vector<8x192xf32> to vector<8x64xf32>
    %55 = vector.extract_strided_slice %45 {offsets = [0, 192], sizes = [8, 64], strides = [1, 1]} : vector<8x256xf32> to vector<8x64xf32>
    %56 = math.tanh %55 : vector<8x64xf32>
    %57 = arith.mulf %53, %33 : vector<8x64xf32>
    %58 = arith.mulf %52, %56 : vector<8x64xf32>
    %59 = arith.addf %57, %58 : vector<8x64xf32>
    %60 = math.tanh %59 : vector<8x64xf32>
    %61 = arith.mulf %54, %60 : vector<8x64xf32>
    %62 = arith.truncf %61 : vector<8x64xf32> to vector<8x64xbf16>
    %63 = arith.index_cast %c1_i32 : i32 to index
    %c0_27 = arith.constant 0 : index
    %c0_28 = arith.constant 0 : index
    %64 = vector.load %arg12[%63, %c0_27, %c0_28] : memref<8x8x64xbf16, #tpu.memory_space<vmem>>, vector<1x8x64xbf16>
    %65 = vector.shape_cast %64 : vector<1x8x64xbf16> to vector<8x64xbf16>
    %66 = vector.shape_cast %62 : vector<8x64xbf16> to vector<1x8x64xbf16>
    tpu.vector_store %arg12[%63, %c0_27, %c0_28], %66 {strides = array<i32>} : memref<8x8x64xbf16, #tpu.memory_space<vmem>>, vector<1x8x64xbf16>,
    %c2_i32 = arith.constant 2 : i32
    %67 = arith.index_cast %c2_i32 : i32 to index
    %c0_29 = arith.constant 0 : index
    %c0_30 = arith.constant 0 : index
    %68 = vector.load %arg11[%67, %c0_29, %c0_30] : memref<8x8x256xf32, #tpu.memory_space<vmem>>, vector<1x8x256xf32>
    %69 = vector.shape_cast %68 : vector<1x8x256xf32> to vector<8x256xf32>
    %cst_31 = arith.constant dense<0.000000e+00> : vector<8x256xf32>
    %70 = tpu.matmul %62, %12, %cst_31 {dimension_numbers = #tpu.dot_dimension_numbers<[1], [0], [0], [1], [0, 0, 1, 1], [], []>} : vector<8x64xbf16>, vector<64x256xbf16>, vector<8x256xf32> -> vector<8x256xf32>
    %71 = arith.addf %69, %70 : vector<8x256xf32>
    %72 = vector.extract_strided_slice %71 {offsets = [0, 0], sizes = [8, 192], strides = [1, 1]} : vector<8x256xf32> to vector<8x192xf32>
    %73 = arith.negf %72 : vector<8x192xf32>
    %74 = math.exp %73 : vector<8x192xf32>
    %cst_32 = arith.constant 1.000000e+00 : f32
    %75 = vector.broadcast %cst_32 : f32 to vector<8x192xf32>
    %76 = arith.addf %75, %74 : vector<8x192xf32>
    %77 = arith.divf %75, %76 : vector<8x192xf32>
    %78 = vector.extract_strided_slice %77 {offsets = [0, 0], sizes = [8, 64], strides = [1, 1]} : vector<8x192xf32> to vector<8x64xf32>
    %79 = vector.extract_strided_slice %77 {offsets = [0, 64], sizes = [8, 64], strides = [1, 1]} : vector<8x192xf32> to vector<8x64xf32>
    %80 = vector.extract_strided_slice %77 {offsets = [0, 128], sizes = [8, 64], strides = [1, 1]} : vector<8x192xf32> to vector<8x64xf32>
    %81 = vector.extract_strided_slice %71 {offsets = [0, 192], sizes = [8, 64], strides = [1, 1]} : vector<8x256xf32> to vector<8x64xf32>
    %82 = math.tanh %81 : vector<8x64xf32>
    %83 = arith.mulf %79, %59 : vector<8x64xf32>
    %84 = arith.mulf %78, %82 : vector<8x64xf32>
    %85 = arith.addf %83, %84 : vector<8x64xf32>
    %86 = math.tanh %85 : vector<8x64xf32>
    %87 = arith.mulf %80, %86 : vector<8x64xf32>
    %88 = arith.truncf %87 : vector<8x64xf32> to vector<8x64xbf16>
    %89 = arith.index_cast %c2_i32 : i32 to index
    %c0_33 = arith.constant 0 : index
    %c0_34 = arith.constant 0 : index
    %90 = vector.load %arg12[%89, %c0_33, %c0_34] : memref<8x8x64xbf16, #tpu.memory_space<vmem>>, vector<1x8x64xbf16>
    %91 = vector.shape_cast %90 : vector<1x8x64xbf16> to vector<8x64xbf16>
    %92 = vector.shape_cast %88 : vector<8x64xbf16> to vector<1x8x64xbf16>
    tpu.vector_store %arg12[%89, %c0_33, %c0_34], %92 {strides = array<i32>} : memref<8x8x64xbf16, #tpu.memory_space<vmem>>, vector<1x8x64xbf16>,
    %c3_i32 = arith.constant 3 : i32
    %93 = arith.index_cast %c3_i32 : i32 to index
    %c0_35 = arith.constant 0 : index
    %c0_36 = arith.constant 0 : index
    %94 = vector.load %arg11[%93, %c0_35, %c0_36] : memref<8x8x256xf32, #tpu.memory_space<vmem>>, vector<1x8x256xf32>
    %95 = vector.shape_cast %94 : vector<1x8x256xf32> to vector<8x256xf32>
    %cst_37 = arith.constant dense<0.000000e+00> : vector<8x256xf32>
    %96 = tpu.matmul %88, %12, %cst_37 {dimension_numbers = #tpu.dot_dimension_numbers<[1], [0], [0], [1], [0, 0, 1, 1], [], []>} : vector<8x64xbf16>, vector<64x256xbf16>, vector<8x256xf32> -> vector<8x256xf32>
    %97 = arith.addf %95, %96 : vector<8x256xf32>
    %98 = vector.extract_strided_slice %97 {offsets = [0, 0], sizes = [8, 192], strides = [1, 1]} : vector<8x256xf32> to vector<8x192xf32>
    %99 = arith.negf %98 : vector<8x192xf32>
    %100 = math.exp %99 : vector<8x192xf32>
    %cst_38 = arith.constant 1.000000e+00 : f32
    %101 = vector.broadcast %cst_38 : f32 to vector<8x192xf32>
    %102 = arith.addf %101, %100 : vector<8x192xf32>
    %103 = arith.divf %101, %102 : vector<8x192xf32>
    %104 = vector.extract_strided_slice %103 {offsets = [0, 0], sizes = [8, 64], strides = [1, 1]} : vector<8x192xf32> to vector<8x64xf32>
    %105 = vector.extract_strided_slice %103 {offsets = [0, 64], sizes = [8, 64], strides = [1, 1]} : vector<8x192xf32> to vector<8x64xf32>
    %106 = vector.extract_strided_slice %103 {offsets = [0, 128], sizes = [8, 64], strides = [1, 1]} : vector<8x192xf32> to vector<8x64xf32>
    %107 = vector.extract_strided_slice %97 {offsets = [0, 192], sizes = [8, 64], strides = [1, 1]} : vector<8x256xf32> to vector<8x64xf32>
    %108 = math.tanh %107 : vector<8x64xf32>
    %109 = arith.mulf %105, %85 : vector<8x64xf32>
    %110 = arith.mulf %104, %108 : vector<8x64xf32>
    %111 = arith.addf %109, %110 : vector<8x64xf32>
    %112 = math.tanh %111 : vector<8x64xf32>
    %113 = arith.mulf %106, %112 : vector<8x64xf32>
    %114 = arith.truncf %113 : vector<8x64xf32> to vector<8x64xbf16>
    %115 = arith.index_cast %c3_i32 : i32 to index
    %c0_39 = arith.constant 0 : index
    %c0_40 = arith.constant 0 : index
    %116 = vector.load %arg12[%115, %c0_39, %c0_40] : memref<8x8x64xbf16, #tpu.memory_space<vmem>>, vector<1x8x64xbf16>
    %117 = vector.shape_cast %116 : vector<1x8x64xbf16> to vector<8x64xbf16>
    %118 = vector.shape_cast %114 : vector<8x64xbf16> to vector<1x8x64xbf16>
    tpu.vector_store %arg12[%115, %c0_39, %c0_40], %118 {strides = array<i32>} : memref<8x8x64xbf16, #tpu.memory_space<vmem>>, vector<1x8x64xbf16>,
    %c4_i32 = arith.constant 4 : i32
    %119 = arith.index_cast %c4_i32 : i32 to index
    %c0_41 = arith.constant 0 : index
    %c0_42 = arith.constant 0 : index
    %120 = vector.load %arg11[%119, %c0_41, %c0_42] : memref<8x8x256xf32, #tpu.memory_space<vmem>>, vector<1x8x256xf32>
    %121 = vector.shape_cast %120 : vector<1x8x256xf32> to vector<8x256xf32>
    %cst_43 = arith.constant dense<0.000000e+00> : vector<8x256xf32>
    %122 = tpu.matmul %114, %12, %cst_43 {dimension_numbers = #tpu.dot_dimension_numbers<[1], [0], [0], [1], [0, 0, 1, 1], [], []>} : vector<8x64xbf16>, vector<64x256xbf16>, vector<8x256xf32> -> vector<8x256xf32>
    %123 = arith.addf %121, %122 : vector<8x256xf32>
    %124 = vector.extract_strided_slice %123 {offsets = [0, 0], sizes = [8, 192], strides = [1, 1]} : vector<8x256xf32> to vector<8x192xf32>
    %125 = arith.negf %124 : vector<8x192xf32>
    %126 = math.exp %125 : vector<8x192xf32>
    %cst_44 = arith.constant 1.000000e+00 : f32
    %127 = vector.broadcast %cst_44 : f32 to vector<8x192xf32>
    %128 = arith.addf %127, %126 : vector<8x192xf32>
    %129 = arith.divf %127, %128 : vector<8x192xf32>
    %130 = vector.extract_strided_slice %129 {offsets = [0, 0], sizes = [8, 64], strides = [1, 1]} : vector<8x192xf32> to vector<8x64xf32>
    %131 = vector.extract_strided_slice %129 {offsets = [0, 64], sizes = [8, 64], strides = [1, 1]} : vector<8x192xf32> to vector<8x64xf32>
    %132 = vector.extract_strided_slice %129 {offsets = [0, 128], sizes = [8, 64], strides = [1, 1]} : vector<8x192xf32> to vector<8x64xf32>
    %133 = vector.extract_strided_slice %123 {offsets = [0, 192], sizes = [8, 64], strides = [1, 1]} : vector<8x256xf32> to vector<8x64xf32>
    %134 = math.tanh %133 : vector<8x64xf32>
    %135 = arith.mulf %131, %111 : vector<8x64xf32>
    %136 = arith.mulf %130, %134 : vector<8x64xf32>
    %137 = arith.addf %135, %136 : vector<8x64xf32>
    %138 = math.tanh %137 : vector<8x64xf32>
    %139 = arith.mulf %132, %138 : vector<8x64xf32>
    %140 = arith.truncf %139 : vector<8x64xf32> to vector<8x64xbf16>
    %141 = arith.index_cast %c4_i32 : i32 to index
    %c0_45 = arith.constant 0 : index
    %c0_46 = arith.constant 0 : index
    %142 = vector.load %arg12[%141, %c0_45, %c0_46] : memref<8x8x64xbf16, #tpu.memory_space<vmem>>, vector<1x8x64xbf16>
    %143 = vector.shape_cast %142 : vector<1x8x64xbf16> to vector<8x64xbf16>
    %144 = vector.shape_cast %140 : vector<8x64xbf16> to vector<1x8x64xbf16>
    tpu.vector_store %arg12[%141, %c0_45, %c0_46], %144 {strides = array<i32>} : memref<8x8x64xbf16, #tpu.memory_space<vmem>>, vector<1x8x64xbf16>,
    %c5_i32 = arith.constant 5 : i32
    %145 = arith.index_cast %c5_i32 : i32 to index
    %c0_47 = arith.constant 0 : index
    %c0_48 = arith.constant 0 : index
    %146 = vector.load %arg11[%145, %c0_47, %c0_48] : memref<8x8x256xf32, #tpu.memory_space<vmem>>, vector<1x8x256xf32>
    %147 = vector.shape_cast %146 : vector<1x8x256xf32> to vector<8x256xf32>
    %cst_49 = arith.constant dense<0.000000e+00> : vector<8x256xf32>
    %148 = tpu.matmul %140, %12, %cst_49 {dimension_numbers = #tpu.dot_dimension_numbers<[1], [0], [0], [1], [0, 0, 1, 1], [], []>} : vector<8x64xbf16>, vector<64x256xbf16>, vector<8x256xf32> -> vector<8x256xf32>
    %149 = arith.addf %147, %148 : vector<8x256xf32>
    %150 = vector.extract_strided_slice %149 {offsets = [0, 0], sizes = [8, 192], strides = [1, 1]} : vector<8x256xf32> to vector<8x192xf32>
    %151 = arith.negf %150 : vector<8x192xf32>
    %152 = math.exp %151 : vector<8x192xf32>
    %cst_50 = arith.constant 1.000000e+00 : f32
    %153 = vector.broadcast %cst_50 : f32 to vector<8x192xf32>
    %154 = arith.addf %153, %152 : vector<8x192xf32>
    %155 = arith.divf %153, %154 : vector<8x192xf32>
    %156 = vector.extract_strided_slice %155 {offsets = [0, 0], sizes = [8, 64], strides = [1, 1]} : vector<8x192xf32> to vector<8x64xf32>
    %157 = vector.extract_strided_slice %155 {offsets = [0, 64], sizes = [8, 64], strides = [1, 1]} : vector<8x192xf32> to vector<8x64xf32>
    %158 = vector.extract_strided_slice %155 {offsets = [0, 128], sizes = [8, 64], strides = [1, 1]} : vector<8x192xf32> to vector<8x64xf32>
    %159 = vector.extract_strided_slice %149 {offsets = [0, 192], sizes = [8, 64], strides = [1, 1]} : vector<8x256xf32> to vector<8x64xf32>
    %160 = math.tanh %159 : vector<8x64xf32>
    %161 = arith.mulf %157, %137 : vector<8x64xf32>
    %162 = arith.mulf %156, %160 : vector<8x64xf32>
    %163 = arith.addf %161, %162 : vector<8x64xf32>
    %164 = math.tanh %163 : vector<8x64xf32>
    %165 = arith.mulf %158, %164 : vector<8x64xf32>
    %166 = arith.truncf %165 : vector<8x64xf32> to vector<8x64xbf16>
    %167 = arith.index_cast %c5_i32 : i32 to index
    %c0_51 = arith.constant 0 : index
    %c0_52 = arith.constant 0 : index
    %168 = vector.load %arg12[%167, %c0_51, %c0_52] : memref<8x8x64xbf16, #tpu.memory_space<vmem>>, vector<1x8x64xbf16>
    %169 = vector.shape_cast %168 : vector<1x8x64xbf16> to vector<8x64xbf16>
    %170 = vector.shape_cast %166 : vector<8x64xbf16> to vector<1x8x64xbf16>
    tpu.vector_store %arg12[%167, %c0_51, %c0_52], %170 {strides = array<i32>} : memref<8x8x64xbf16, #tpu.memory_space<vmem>>, vector<1x8x64xbf16>,
    %c6_i32 = arith.constant 6 : i32
    %171 = arith.index_cast %c6_i32 : i32 to index
    %c0_53 = arith.constant 0 : index
    %c0_54 = arith.constant 0 : index
    %172 = vector.load %arg11[%171, %c0_53, %c0_54] : memref<8x8x256xf32, #tpu.memory_space<vmem>>, vector<1x8x256xf32>
    %173 = vector.shape_cast %172 : vector<1x8x256xf32> to vector<8x256xf32>
    %cst_55 = arith.constant dense<0.000000e+00> : vector<8x256xf32>
    %174 = tpu.matmul %166, %12, %cst_55 {dimension_numbers = #tpu.dot_dimension_numbers<[1], [0], [0], [1], [0, 0, 1, 1], [], []>} : vector<8x64xbf16>, vector<64x256xbf16>, vector<8x256xf32> -> vector<8x256xf32>
    %175 = arith.addf %173, %174 : vector<8x256xf32>
    %176 = vector.extract_strided_slice %175 {offsets = [0, 0], sizes = [8, 192], strides = [1, 1]} : vector<8x256xf32> to vector<8x192xf32>
    %177 = arith.negf %176 : vector<8x192xf32>
    %178 = math.exp %177 : vector<8x192xf32>
    %cst_56 = arith.constant 1.000000e+00 : f32
    %179 = vector.broadcast %cst_56 : f32 to vector<8x192xf32>
    %180 = arith.addf %179, %178 : vector<8x192xf32>
    %181 = arith.divf %179, %180 : vector<8x192xf32>
    %182 = vector.extract_strided_slice %181 {offsets = [0, 0], sizes = [8, 64], strides = [1, 1]} : vector<8x192xf32> to vector<8x64xf32>
    %183 = vector.extract_strided_slice %181 {offsets = [0, 64], sizes = [8, 64], strides = [1, 1]} : vector<8x192xf32> to vector<8x64xf32>
    %184 = vector.extract_strided_slice %181 {offsets = [0, 128], sizes = [8, 64], strides = [1, 1]} : vector<8x192xf32> to vector<8x64xf32>
    %185 = vector.extract_strided_slice %175 {offsets = [0, 192], sizes = [8, 64], strides = [1, 1]} : vector<8x256xf32> to vector<8x64xf32>
    %186 = math.tanh %185 : vector<8x64xf32>
    %187 = arith.mulf %183, %163 : vector<8x64xf32>
    %188 = arith.mulf %182, %186 : vector<8x64xf32>
    %189 = arith.addf %187, %188 : vector<8x64xf32>
    %190 = math.tanh %189 : vector<8x64xf32>
    %191 = arith.mulf %184, %190 : vector<8x64xf32>
    %192 = arith.truncf %191 : vector<8x64xf32> to vector<8x64xbf16>
    %193 = arith.index_cast %c6_i32 : i32 to index
    %c0_57 = arith.constant 0 : index
    %c0_58 = arith.constant 0 : index
    %194 = vector.load %arg12[%193, %c0_57, %c0_58] : memref<8x8x64xbf16, #tpu.memory_space<vmem>>, vector<1x8x64xbf16>
    %195 = vector.shape_cast %194 : vector<1x8x64xbf16> to vector<8x64xbf16>
    %196 = vector.shape_cast %192 : vector<8x64xbf16> to vector<1x8x64xbf16>
    tpu.vector_store %arg12[%193, %c0_57, %c0_58], %196 {strides = array<i32>} : memref<8x8x64xbf16, #tpu.memory_space<vmem>>, vector<1x8x64xbf16>,
    %c7_i32 = arith.constant 7 : i32
    %197 = arith.index_cast %c7_i32 : i32 to index
    %c0_59 = arith.constant 0 : index
    %c0_60 = arith.constant 0 : index
    %198 = vector.load %arg11[%197, %c0_59, %c0_60] : memref<8x8x256xf32, #tpu.memory_space<vmem>>, vector<1x8x256xf32>
    %199 = vector.shape_cast %198 : vector<1x8x256xf32> to vector<8x256xf32>
    %cst_61 = arith.constant dense<0.000000e+00> : vector<8x256xf32>
    %200 = tpu.matmul %192, %12, %cst_61 {dimension_numbers = #tpu.dot_dimension_numbers<[1], [0], [0], [1], [0, 0, 1, 1], [], []>} : vector<8x64xbf16>, vector<64x256xbf16>, vector<8x256xf32> -> vector<8x256xf32>
    %201 = arith.addf %199, %200 : vector<8x256xf32>
    %202 = vector.extract_strided_slice %201 {offsets = [0, 0], sizes = [8, 192], strides = [1, 1]} : vector<8x256xf32> to vector<8x192xf32>
    %203 = arith.negf %202 : vector<8x192xf32>
    %204 = math.exp %203 : vector<8x192xf32>
    %cst_62 = arith.constant 1.000000e+00 : f32
    %205 = vector.broadcast %cst_62 : f32 to vector<8x192xf32>
    %206 = arith.addf %205, %204 : vector<8x192xf32>
    %207 = arith.divf %205, %206 : vector<8x192xf32>
    %208 = vector.extract_strided_slice %207 {offsets = [0, 0], sizes = [8, 64], strides = [1, 1]} : vector<8x192xf32> to vector<8x64xf32>
    %209 = vector.extract_strided_slice %207 {offsets = [0, 64], sizes = [8, 64], strides = [1, 1]} : vector<8x192xf32> to vector<8x64xf32>
    %210 = vector.extract_strided_slice %207 {offsets = [0, 128], sizes = [8, 64], strides = [1, 1]} : vector<8x192xf32> to vector<8x64xf32>
    %211 = vector.extract_strided_slice %201 {offsets = [0, 192], sizes = [8, 64], strides = [1, 1]} : vector<8x256xf32> to vector<8x64xf32>
    %212 = math.tanh %211 : vector<8x64xf32>
    %213 = arith.mulf %209, %189 : vector<8x64xf32>
    %214 = arith.mulf %208, %212 : vector<8x64xf32>
    %215 = arith.addf %213, %214 : vector<8x64xf32>
    %216 = math.tanh %215 : vector<8x64xf32>
    %217 = arith.mulf %210, %216 : vector<8x64xf32>
    %218 = arith.truncf %217 : vector<8x64xf32> to vector<8x64xbf16>
    %219 = arith.index_cast %c7_i32 : i32 to index
    %c0_63 = arith.constant 0 : index
    %c0_64 = arith.constant 0 : index
    %220 = vector.load %arg12[%219, %c0_63, %c0_64] : memref<8x8x64xbf16, #tpu.memory_space<vmem>>, vector<1x8x64xbf16>
    %221 = vector.shape_cast %220 : vector<1x8x64xbf16> to vector<8x64xbf16>
    %222 = vector.shape_cast %218 : vector<8x64xbf16> to vector<1x8x64xbf16>
    tpu.vector_store %arg12[%219, %c0_63, %c0_64], %222 {strides = array<i32>} : memref<8x8x64xbf16, #tpu.memory_space<vmem>>, vector<1x8x64xbf16>,
    %c8_i32 = arith.constant 8 : i32
    %c0_65 = arith.constant 0 : index
    %c0_66 = arith.constant 0 : index
    %223 = vector.load %arg9[%c0_65, %c0_66] : memref<8x64xbf16, #tpu.memory_space<vmem>>, vector<8x64xbf16>
    tpu.vector_store %arg9[%c0_65, %c0_66], %218 {strides = array<i32>} : memref<8x64xbf16, #tpu.memory_space<vmem>>, vector<8x64xbf16>,
    %c0_67 = arith.constant 0 : index
    %c0_68 = arith.constant 0 : index
    %224 = vector.load %arg10[%c0_67, %c0_68] : memref<8x64xf32, #tpu.memory_space<vmem>>, vector<8x64xf32>
    tpu.vector_store %arg10[%c0_67, %c0_68], %215 {strides = array<i32>} : memref<8x64xf32, #tpu.memory_space<vmem>>, vector<8x64xf32>,
    %c0_69 = arith.constant 0 : index
    %c0_70 = arith.constant 0 : index
    %c0_71 = arith.constant 0 : index
    %225 = vector.load %arg12[%c0_69, %c0_70, %c0_71] : memref<8x8x64xbf16, #tpu.memory_space<vmem>>, vector<8x8x64xbf16>
    %226 = arith.extf %225 : vector<8x8x64xbf16> to vector<8x8x64xf32>
    %c0_72 = arith.constant 0 : index
    %c0_73 = arith.constant 0 : index
    %227 = vector.load %arg6[%c0_72, %c0_73] : memref<1x64xf32, #tpu.memory_space<vmem>>, vector<1x64xf32>
    %228 = vector.shape_cast %227 : vector<1x64xf32> to vector<1x1x64xf32>
    %229 = vector.broadcast %228 : vector<1x1x64xf32> to vector<8x8x64xf32>
    %230 = arith.mulf %226, %229 : vector<8x8x64xf32>
    %cst_74 = arith.constant dense<0.000000e+00> : vector<8x8xf32>
    %231 = vector.multi_reduction <add>, %230, %cst_74 [2] : vector<8x8x64xf32> to vector<8x8xf32>
    %c0_75 = arith.constant 0 : index
    %c0_76 = arith.constant 0 : index
    %232 = vector.load %arg7[%c0_75, %c0_76] : memref<1x1xf32, #tpu.memory_space<vmem>>, vector<1x1xf32>
    %233 = vector.broadcast %232 : vector<1x1xf32> to vector<8x8xf32>
    %234 = arith.addf %231, %233 : vector<8x8xf32>
    %c0_77 = arith.constant 0 : index
    %c0_78 = arith.constant 0 : index
    %235 = vector.load %arg8[%c0_77, %c0_78] : memref<8x8xf32, #tpu.memory_space<vmem>>, vector<8x8xf32>
    tpu.vector_store %arg8[%c0_77, %c0_78], %234 {strides = array<i32>} : memref<8x8xf32, #tpu.memory_space<vmem>>, vector<8x8xf32>,
    return
  }
  func.func @transform_0(%arg0: i32, %arg1: i32) -> (i32, i32, i32) {
    %c0_i32 = arith.constant 0 : i32
    %c0_i32_0 = arith.constant 0 : i32
    return %arg1, %arg0, %c0_i32 : i32, i32, i32
  }
  func.func @transform_1(%arg0: i32, %arg1: i32) -> (i32, i32) {
    %c0_i32 = arith.constant 0 : i32
    %c0_i32_0 = arith.constant 0 : i32
    %c0_i32_1 = arith.constant 0 : i32
    return %c0_i32, %c0_i32_0 : i32, i32
  }
  func.func @transform_2(%arg0: i32, %arg1: i32) -> (i32, i32) {
    %c0_i32 = arith.constant 0 : i32
    %c0_i32_0 = arith.constant 0 : i32
    %c0_i32_1 = arith.constant 0 : i32
    return %c0_i32, %c0_i32_0 : i32, i32
  }
  func.func @transform_3(%arg0: i32, %arg1: i32) -> (i32, i32) {
    %c0_i32 = arith.constant 0 : i32
    %c0_i32_0 = arith.constant 0 : i32
    %c0_i32_1 = arith.constant 0 : i32
    return %c0_i32, %c0_i32_0 : i32, i32
  }
  func.func @transform_4(%arg0: i32, %arg1: i32) -> (i32, i32) {
    %c0_i32 = arith.constant 0 : i32
    %c0_i32_0 = arith.constant 0 : i32
    %c0_i32_1 = arith.constant 0 : i32
    return %c0_i32, %c0_i32_0 : i32, i32
  }
  func.func @transform_5(%arg0: i32, %arg1: i32) -> (i32, i32) {
    %c0_i32 = arith.constant 0 : i32
    %c0_i32_0 = arith.constant 0 : i32
    %c0_i32_1 = arith.constant 0 : i32
    return %c0_i32, %c0_i32_0 : i32, i32
  }
  func.func @transform_6(%arg0: i32, %arg1: i32) -> (i32, i32) {
    %c0_i32 = arith.constant 0 : i32
    return %arg1, %arg0 : i32, i32
  }
}

</mosaic_0001>

<bundles_post_ra>
// kernel: rnn_forward.1
= control target key start
LH: loop header
LB: loop body
LE: loop exit
PB: predicated region body
PF: predicated region fallthrough
CT: control target
= control target key end

     0   :  { %vm30_vm0 = vcmask 519168   ;;  %v1297_v3 = vmov 0   ;;  %vm86_vm1 = vcmask 1041408   ;;  %vm73_vm2 = vcmask 31744   ;;  %s1299_s9 = smov 64   ;;  %s1632_s2 = inlined_call_operand.vmem [shape: bf16[64,256], index: 2, kind: input, shape index: {}]   ;;  %s1633_s1 = inlined_call_operand.vmem [shape: bf16[4,256], index: 1, kind: input, shape index: {}]   ;;  %s1634_s0 = inlined_call_operand.vmem [shape: bf16[8,8,4], index: 0, kind: input, shape index: {}]   ;;  %s1635_s3 = inlined_call_operand.vmem [shape: f32[1,256], index: 3, kind: input, shape index: {}]   ;;  %s1636_s4 = inlined_call_operand.vmem [shape: f32[1,64], index: 4, kind: input, shape index: {}]   ;;  %s1637_s5 = inlined_call_operand.<no memory space> [shape: f32[1,1], index: 5, kind: input, shape index: {}]   ;;  %s1638_s6 = inlined_call_operand.vmem [shape: f32[8,8], index: 6, kind: output, shape index: {}]  }
   0x1   :  { %v1173_v0 = vld [vmem:[%s1632_s2 + $0x34] sm:$0xf]  ;;  %v1127_v1 = vld [vmem:[%s1632_s2 + $0x38] sm:$0xf0]  ;;  %v1171_v2 = vld [vmem:[%s1632_s2 + $0x24] sm:$0xf]  ;;  %1197 = vset.pattern.permute.xlu2 %v1297_v3  ;;  %1198 = vset.pattern.permute.xlu0 %v1297_v3 }
   0x2   :  { %v1344_v4 = vor.u32 %v1173_v0, %v1127_v1  ;;  %v1119_v5 = vld [vmem:[%s1632_s2 + $0x28] sm:$0xf0]  ;;  %v42_v6 = vld [vmem:[%s1633_s1] sm:$0xf]  ;;  %v1169_v8 = vld [vmem:[%s1632_s2 + $0x14] sm:$0xf] }
   0x3   :  { %70 = vst [vmem:[#allocation1] ss:$4 sm:$0xff] %v42_v6  ;;  %v1353_v7 = vor.u32 %v1171_v2, %v1119_v5  ;;  %v1111_v9 = vld [vmem:[%s1632_s2 + $0x18] sm:$0xf0]  ;;  %v1125_v10 = vld [vmem:[%s1632_s2 + $0x30] sm:$0xf] }
   0x4   :  { %238 = vmatpush.bf16.msra.mxu3 %v1344_v4  ;;  %31 = vst.msk [vmem:[#allocation2] sm:$0xf] %vm30_vm0, %v1297_v3  ;;  %v1174_v11 = vld [vmem:[%s1632_s2 + $0x34] sm:$0xf0]  ;;  %v1117_v13 = vld [vmem:[%s1632_s2 + $0x20] sm:$0xf]  ;;  %v1377_v15 = vor.u32 %v1169_v8, %v1111_v9 }
   0x5   :  { %v1368_v12 = vor.u32 %v1174_v11, %v1125_v10  ;;  %v1172_v14 = vld [vmem:[%s1632_s2 + $0x24] sm:$0xf0]  ;;  %v1167_v16 = vld [vmem:[%s1632_s2 + $0x4] sm:$0xf]  ;;  %v1103_v17 = vld [vmem:[%s1632_s2 + $0x8] sm:$0xf0] }
   0x6   :  { %v1386_v18 = vor.u32 %v1172_v14, %v1117_v13  ;;  %v1109_v19 = vld [vmem:[%s1632_s2 + $0x10] sm:$0xf]  ;;  %v1170_v20 = vld [vmem:[%s1632_s2 + $0x14] sm:$0xf0]  ;;  %v1163_v24 = vld [vmem:[%s1634_s0] sm:$0xff]  ;;  %v1398_v26 = vor.u32 %v1167_v16, %v1103_v17  ;;  %vm32_vm3 = vcmask 523264  }
   0x7   :  { %225 = vmatpush.bf16.msra.mxu2 %v1368_v12  ;;  %v1401_v27 = vor.u32 %v1170_v20, %v1109_v19  ;;  %v1101_v28 = vld [vmem:[%s1632_s2] sm:$0xf]  ;;  %v1168_v29 = vld [vmem:[%s1632_s2 + $0x4] sm:$0xf0]  ;;  %v1298_v32 = vmov 0.0  }
   0x8   :  { %239 = vmatpush.bf16.msra.mxu3 %v1353_v7  ;;  %v1415_v31 = vor.u32 %v1168_v29, %v1101_v28  ;;  %33 = vst.msk [vmem:[#allocation3] sm:$0xff] %vm32_vm3, %v1298_v32  ;;  %v43_v33 = vld [vmem:[%s1635_s3] sm:$0x3] }
   0x9   :  { %v1454_v34 = vperm.slane %v43_v33, 1  ;;  %v1459_v44 = vperm.slane %v43_v33, 0 }
   0xa   :  { %v72_v21 = vld.sshfl [vmem:[#allocation1 + $0x8] sm:$0xff pattern:$0x73625140]  ;;  %v71_v22 = vld.sshfl [vmem:[#allocation1] sm:$0xff pattern:$0x73625140] }
   0xb   :  { %v89_v23 = vsel %vm86_vm1, %v72_v21, 0  ;;  %v87_v25 = vsel %vm86_vm1, %v71_v22, 0  ;;  %226 = vmatpush.bf16.msra.mxu2 %v1386_v18  ;;  %v173_v30 = vld [vmem:[#allocation2] sm:$0xf] }
   0xc   :  { %127 = vmatpush.bf16.msra.mxu1 %v89_v23  ;;  %240 = vmatpush.bf16.msra.mxu3 %v1377_v15 }
   0xd   :  { %98 = vmatpush.bf16.msra.mxu0 %v87_v25 }
   0xf   :  { %1095 = vmatmul.msk.bf16.vlgmr.msra.gmra.mxu1 %vm73_vm2, %v1163_v24  ;;  %227 = vmatpush.bf16.msra.mxu2 %v1401_v27  ;;  %v174_v43 = vld [vmem:[#allocation3] sm:$0xff] }
  0x10   :  { %614 = vmatpush.bf16.msrb.mxu1 %v1344_v4  ;;  %241 = vmatpush.bf16.msra.mxu3 %v1398_v26 }
  0x11   :  { %601 = vmatpush.bf16.msrb.mxu0 %v1368_v12 }
  0x12   :  { %1091 = vmatmul.msk.bf16.vlgmr.msra.gmra.mxu0 %vm73_vm2, %v1163_v24 }
  0x13   :  { %1132 = vmatmul.msk.bf16.vlgmr.msra.gmra.mxu3 %vm32_vm3, %v173_v30  ;;  %228 = vmatpush.bf16.msra.mxu2 %v1415_v31 }
  0x14   :  { %335 = vmatpush.bf16.msrb.mxu3 %v1344_v4  ;;  %615 = vmatpush.bf16.msrb.mxu1 %v1353_v7 }
  0x15   :  { %602 = vmatpush.bf16.msrb.mxu0 %v1386_v18 }
  0x16   :  { %1131 = vmatmul.msk.bf16.vlgmr.msra.gmra.mxu2 %vm32_vm3, %v173_v30 }
  0x17   :  { %322 = vmatpush.bf16.msrb.mxu2 %v1368_v12 }
  0x18   :  { %336 = vmatpush.bf16.msrb.mxu3 %v1353_v7  ;;  %616 = vmatpush.bf16.msrb.mxu1 %v1377_v15 }
  0x19   :  { %603 = vmatpush.bf16.msrb.mxu0 %v1401_v27 }
  0x1b   :  { %323 = vmatpush.bf16.msrb.mxu2 %v1386_v18 }
  0x1c   :  { %337 = vmatpush.bf16.msrb.mxu3 %v1377_v15  ;;  %617 = vmatpush.bf16.msrb.mxu1 %v1398_v26 }
  0x1d   :  { %604 = vmatpush.bf16.msrb.mxu0 %v1415_v31 }
  0x1f   :  { %324 = vmatpush.bf16.msrb.mxu2 %v1401_v27 }
  0x20   :  { %800 = vmatpush.bf16.msra.mxu1 %v1344_v4  ;;  %338 = vmatpush.bf16.msrb.mxu3 %v1398_v26 }
  0x21   :  { %787 = vmatpush.bf16.msra.mxu0 %v1368_v12 }
  0x23   :  { %325 = vmatpush.bf16.msrb.mxu2 %v1415_v31 }
  0x24   :  { %428 = vmatpush.bf16.msra.mxu3 %v1344_v4  ;;  %801 = vmatpush.bf16.msra.mxu1 %v1353_v7 }
  0x25   :  { %788 = vmatpush.bf16.msra.mxu0 %v1386_v18 }
  0x27   :  { %415 = vmatpush.bf16.msra.mxu2 %v1368_v12 }
  0x28   :  { %429 = vmatpush.bf16.msra.mxu3 %v1353_v7  ;;  %802 = vmatpush.bf16.msra.mxu1 %v1377_v15 }
  0x29   :  { %789 = vmatpush.bf16.msra.mxu0 %v1401_v27 }
  0x2b   :  { %416 = vmatpush.bf16.msra.mxu2 %v1386_v18 }
  0x2c   :  { %430 = vmatpush.bf16.msra.mxu3 %v1377_v15  ;;  %803 = vmatpush.bf16.msra.mxu1 %v1398_v26 }
  0x2d   :  { %790 = vmatpush.bf16.msra.mxu0 %v1415_v31 }
  0x2f   :  { %417 = vmatpush.bf16.msra.mxu2 %v1401_v27 }
  0x30   :  { %431 = vmatpush.bf16.msra.mxu3 %v1398_v26 }
  0x33   :  { %418 = vmatpush.bf16.msra.mxu2 %v1415_v31 }
  0x8c   :  { %v129_v35 = vpop.f32.mrf.mxu1 }
  0x8d   :  { %v130_v36 = vadd.f32 %v129_v35, %v1454_v34 }
  0x8f   :  { %v100_v45 = vpop.f32.mrf.mxu0 }
  0x90   :  { %v101_v46 = vadd.f32 %v100_v45, %v1459_v44 }
  0x94   :  { %v131_v25 = vpop.f32.mrf.mxu1 }
  0x95   :  { %v132_v28 = vadd.f32 %v131_v25, %v1454_v34 }
  0x96   :  { %v243_v37 = vpop.f32.mrf.mxu3 }
  0x97   :  { %v248_v38 = vadd.f32 %v243_v37, %v130_v36  ;;  %v102_v37 = vpop.f32.mrf.mxu0 }
  0x99   :  { %1201 = vtanh.f32 %v248_v38  ;;  %v230_v39 = vpop.f32.mrf.mxu2  ;;  %v1134_v5 = vmul.f32 -1.442695, %v248_v38  ;;  %v103_v38 = vadd.f32 %v102_v37, %v1459_v44 }
  0x9a   :  { %v247_v47 = vadd.f32 %v230_v39, %v101_v46 }
  0x9c   :  { %v1133_v48 = vmul.f32 -1.442695, %v247_v47 }
  0x9e   :  { %v245_v40 = vpop.f32.mrf.mxu3  ;;  %1203 = vpow2.f32 %v1133_v48 }
  0x9f   :  { %v1202_v41 = vpop.eup %1201 }
  0xa0   :  { %294 = vrot.lane.b32.xlu0 %v1202_v41, %s1299_s9 }
  0xa1   :  { %v232_v42 = vpop.f32.mrf.mxu2 }
  0xa4   :  { %v1204_v49 = vpop.eup %1203 }
  0xa5   :  { %v255_v50 = vadd.f32 1.0, %v1204_v49 }
  0xa7   :  { %1205 = vrcp.f32 %v255_v50  ;;  %vm262_vm4 = vweird.f32 %v255_v50  ;;  %v268_v55 = vand.u32 2147483648, %v255_v50  ;;  %v266_v57 = vand.u32 2147483647, %v255_v50 }
  0xa8   :  { %289 = vrot.lane.b32.xlu0 %v174_v43, %s1299_s9 }
  0xa9   :  { %v269_v58 = vor.u32 1.1754944e-38, %v268_v55  ;;  %vm267_vm7 = vcmp.eq.f32.partialorder %v266_v57, 8.507059e+37 }
  0xad   :  { %v1206_v51 = vpop.eup %1205 }
  0xae   :  { %v258_v52 = vmul.f32 %v1206_v51, %v255_v50  ;;  %vm263_vm5 = vweird.f32 %v1206_v51 }
  0xaf   :  { %vm264_vm6 = vmor %vm262_vm4, %vm263_vm5 }
  0xb0   :  { %v259_v53 = vsub.f32 1.0, %v258_v52 }
  0xb2   :  { %v260_v54 = vmul.f32 %v1206_v51, %v259_v53 }
  0xb4   :  { %v261_v56 = vadd.f32 %v1206_v51, %v260_v54 }
  0xb6   :  { %v265_v59 = vsel %vm264_vm6, %v1206_v51, %v261_v56 }
  0xb7   :  { %v270_v61 = vsel %vm267_vm7, %v269_v58, %v265_v59 }
 0x112   :  { %v295_v60 = vpop.permute.xlu0 %294 }
 0x113   :  { %v297_v62 = vmul.f32 %v295_v60, %v270_v61 }
 0x115   :  { %299 = vrot.lane.b32.xlu1 %v297_v62, %s1299_s9 }
 0x11a   :  { %v290_v63 = vpop.permute.xlu0 %289 }
 0x11b   :  { %v292_v0 = vmul.f32 %v290_v63, %v270_v61  ;;  %v1164_v63 = vld [vmem:[%s1634_s0 + $0x8] sm:$0xff] }
 0x11c   :  { %1096 = vmatmul.msk.bf16.gmra.mxu1 %vm73_vm2, %v1164_v63  ;;  %1092 = vmatmul.msk.bf16.gmra.mxu0 %vm73_vm2, %v1164_v63 }
 0x187   :  { %v300_v1 = vpop.permute.xlu1 %299 }
 0x188   :  { %v1463_v2 = vadd.f32 %v300_v1, %v292_v0 }
 0x18a   :  { %1207 = vtanh.f32 %v1463_v2 }
 0x18b   :  { %1209 = vpow2.f32 %v1134_v5 }
 0x190   :  { %v1208_v3 = vpop.eup %1207 }
 0x191   :  { %305 = vrot.lane.b32.xlu1 %v1208_v3, %s1299_s9  ;;  %v1210_v6 = vpop.eup %1209 }
 0x192   :  { %v256_v8 = vadd.f32 1.0, %v1210_v6 }
 0x194   :  { %1211 = vrcp.f32 %v256_v8  ;;  %v283_v16 = vand.u32 2147483648, %v256_v8  ;;  %vm277_vm9 = vweird.f32 %v256_v8  ;;  %v281_v17 = vand.u32 2147483647, %v256_v8 }
 0x196   :  { %v284_v20 = vor.u32 1.1754944e-38, %v283_v16  ;;  %vm282_vm11 = vcmp.eq.f32.partialorder %v281_v17, 8.507059e+37 }
 0x199   :  { %v134_v17 = vpop.f32.mrf.mxu1 }
 0x19a   :  { %v1212_v9 = vpop.eup %1211 }
 0x19b   :  { %v273_v10 = vmul.f32 %v1212_v9, %v256_v8  ;;  %vm278_vm8 = vweird.f32 %v1212_v9 }
 0x19c   :  { %vm279_vm10 = vmor %vm277_vm9, %vm278_vm8 }
 0x19d   :  { %v274_v11 = vsub.f32 1.0, %v273_v10 }
 0x19f   :  { %v275_v13 = vmul.f32 %v1212_v9, %v274_v11 }
 0x1a1   :  { %v276_v14 = vadd.f32 %v1212_v9, %v275_v13 }
 0x1a3   :  { %v280_v19 = vsel %vm279_vm10, %v1212_v9, %v276_v14 }
 0x1a4   :  { %v285_v21 = vsel %vm282_vm11, %v284_v20, %v280_v19  ;;  %v135_v19 = vadd.f32 %v134_v17, %v1454_v34 }
 0x203   :  { %v306_v22 = vpop.permute.xlu1 %305 }
 0x204   :  { %v308_v23 = vmul.f32 %v306_v22, %v285_v21 }
 0x206   :  { %v309_v24 = vpack.c.bf16 %v308_v23, %v308_v23 }
 0x208   :  { %311 = vst.msk [vmem:[#allocation5] sm:$0xf] %vm30_vm0, %v309_v24  ;;  %1135 = vmatmul.msk.bf16.vlgmr.msrb.gmra.mxu2 %vm32_vm3, %v309_v24  ;;  %1136 = vmatmul.msk.bf16.vlgmr.msrb.gmra.mxu3 %vm32_vm3, %v309_v24 }
 0x209   :  { %521 = vmatpush.bf16.msrb.mxu3 %v1344_v4  ;;  %508 = vmatpush.bf16.msrb.mxu2 %v1368_v12 }
 0x20d   :  { %522 = vmatpush.bf16.msrb.mxu3 %v1353_v7  ;;  %509 = vmatpush.bf16.msrb.mxu2 %v1386_v18 }
 0x211   :  { %523 = vmatpush.bf16.msrb.mxu3 %v1377_v15  ;;  %510 = vmatpush.bf16.msrb.mxu2 %v1401_v27 }
 0x215   :  { %524 = vmatpush.bf16.msrb.mxu3 %v1398_v26  ;;  %511 = vmatpush.bf16.msrb.mxu2 %v1415_v31 }
 0x28b   :  { %v327_v29 = vpop.f32.mrf.mxu2  ;;  %v340_v30 = vpop.f32.mrf.mxu3 }
 0x28c   :  { %v345_v32 = vadd.f32 %v340_v30, %v132_v28  ;;  %v344_v39 = vadd.f32 %v327_v29, %v103_v38  ;;  %v105_v28 = vpop.f32.mrf.mxu0 }
 0x28d   :  { %v106_v29 = vadd.f32 %v105_v28, %v1459_v44 }
 0x28e   :  { %1213 = vtanh.f32 %v345_v32  ;;  %v1137_v40 = vmul.f32 -1.442695, %v344_v39  ;;  %v1138_v60 = vmul.f32 -1.442695, %v345_v32 }
 0x290   :  { %1215 = vpow2.f32 %v1137_v40 }
 0x293   :  { %v329_v33 = vpop.f32.mrf.mxu2  ;;  %v342_v35 = vpop.f32.mrf.mxu3 }
 0x294   :  { %v1214_v36 = vpop.eup %1213 }
 0x295   :  { %387 = vrot.lane.b32.xlu2 %v1214_v36, %s1299_s9 }
 0x296   :  { %v1216_v41 = vpop.eup %1215 }
 0x297   :  { %v352_v42 = vadd.f32 1.0, %v1216_v41 }
 0x299   :  { %1217 = vrcp.f32 %v352_v42  ;;  %v365_v49 = vand.u32 2147483648, %v352_v42  ;;  %vm359_vm13 = vweird.f32 %v352_v42  ;;  %v363_v50 = vand.u32 2147483647, %v352_v42 }
 0x29b   :  { %v366_v52 = vor.u32 1.1754944e-38, %v365_v49  ;;  %vm364_vm15 = vcmp.eq.f32.partialorder %v363_v50, 8.507059e+37 }
 0x29f   :  { %v1218_v43 = vpop.eup %1217 }
 0x2a0   :  { %v355_v45 = vmul.f32 %v1218_v43, %v352_v42  ;;  %vm360_vm12 = vweird.f32 %v1218_v43 }
 0x2a1   :  { %vm361_vm14 = vmor %vm359_vm13, %vm360_vm12 }
 0x2a2   :  { %v356_v46 = vsub.f32 1.0, %v355_v45 }
 0x2a4   :  { %v357_v47 = vmul.f32 %v1218_v43, %v356_v46 }
 0x2a6   :  { %v358_v48 = vadd.f32 %v1218_v43, %v357_v47 }
 0x2a8   :  { %v362_v51 = vsel %vm361_vm14, %v1218_v43, %v358_v48 }
 0x2a9   :  { %v367_v54 = vsel %vm364_vm15, %v366_v52, %v362_v51 }
 0x2aa   :  { %v385_v56 = vmul.f32 %v367_v54, %v1463_v2 }
 0x2ef   :  { %v388_v53 = vpop.permute.xlu2 %387 }
 0x2f0   :  { %v390_v55 = vmul.f32 %v388_v53, %v367_v54 }
 0x2f2   :  { %392 = vrot.lane.b32.xlu2 %v390_v55, %s1299_s9 }
 0x34c   :  { %v393_v57 = vpop.permute.xlu2 %392 }
 0x34d   :  { %v1483_v58 = vadd.f32 %v393_v57, %v385_v56 }
 0x34f   :  { %1219 = vtanh.f32 %v1483_v58 }
 0x350   :  { %1221 = vpow2.f32 %v1138_v60 }
 0x355   :  { %v1220_v59 = vpop.eup %1219 }
 0x356   :  { %398 = vrot.lane.b32.xlu0 %v1220_v59, %s1299_s9  ;;  %v1222_v61 = vpop.eup %1221 }
 0x357   :  { %v353_v62 = vadd.f32 1.0, %v1222_v61 }
 0x359   :  { %1223 = vrcp.f32 %v353_v62  ;;  %v380_v6 = vand.u32 2147483648, %v353_v62  ;;  %vm374_vm4 = vweird.f32 %v353_v62  ;;  %v378_v8 = vand.u32 2147483647, %v353_v62 }
 0x35b   :  { %v381_v10 = vor.u32 1.1754944e-38, %v380_v6  ;;  %vm379_vm6 = vcmp.eq.f32.partialorder %v378_v8, 8.507059e+37  ;;  %v136_v6 = vpop.f32.mrf.mxu1 }
 0x35c   :  { %v137_v8 = vadd.f32 %v136_v6, %v1454_v34 }
 0x35f   :  { %v1224_v0 = vpop.eup %1223 }
 0x360   :  { %v370_v1 = vmul.f32 %v1224_v0, %v353_v62  ;;  %vm375_vm1 = vweird.f32 %v1224_v0 }
 0x361   :  { %vm376_vm5 = vmor %vm374_vm4, %vm375_vm1 }
 0x362   :  { %v371_v2 = vsub.f32 1.0, %v370_v1 }
 0x364   :  { %v372_v3 = vmul.f32 %v1224_v0, %v371_v2 }
 0x366   :  { %v373_v5 = vadd.f32 %v1224_v0, %v372_v3 }
 0x368   :  { %v377_v9 = vsel %vm376_vm5, %v1224_v0, %v373_v5 }
 0x369   :  { %v382_v11 = vsel %vm379_vm6, %v381_v10, %v377_v9 }
 0x3c8   :  { %v399_v13 = vpop.permute.xlu0 %398 }
 0x3c9   :  { %v401_v14 = vmul.f32 %v399_v13, %v382_v11 }
 0x3cb   :  { %v402_v16 = vpack.c.bf16 %v401_v14, %v401_v14 }
 0x3cd   :  { %404 = vst.msk [vmem:[#allocation5 + $0x4] sm:$0xf] %vm30_vm0, %v402_v16  ;;  %1139 = vmatmul.msk.bf16.vlgmr.msra.gmra.mxu2 %vm32_vm3, %v402_v16  ;;  %1140 = vmatmul.msk.bf16.vlgmr.msra.gmra.mxu3 %vm32_vm3, %v402_v16 }
 0x3ce   :  { %707 = vmatpush.bf16.msra.mxu3 %v1344_v4  ;;  %694 = vmatpush.bf16.msra.mxu2 %v1368_v12 }
 0x3d2   :  { %708 = vmatpush.bf16.msra.mxu3 %v1353_v7  ;;  %695 = vmatpush.bf16.msra.mxu2 %v1386_v18 }
 0x3d6   :  { %709 = vmatpush.bf16.msra.mxu3 %v1377_v15  ;;  %696 = vmatpush.bf16.msra.mxu2 %v1401_v27 }
 0x3da   :  { %710 = vmatpush.bf16.msra.mxu3 %v1398_v26  ;;  %697 = vmatpush.bf16.msra.mxu2 %v1415_v31 }
 0x450   :  { %v420_v20 = vpop.f32.mrf.mxu2  ;;  %v433_v21 = vpop.f32.mrf.mxu3 }
 0x451   :  { %v438_v22 = vadd.f32 %v433_v21, %v135_v19  ;;  %v437_v30 = vadd.f32 %v420_v20, %v106_v29 }
 0x453   :  { %1225 = vtanh.f32 %v438_v22  ;;  %v1141_v32 = vmul.f32 -1.442695, %v437_v30  ;;  %v1142_v53 = vmul.f32 -1.442695, %v438_v22  ;;  %v1165_v30 = vld [vmem:[%s1634_s0 + $0x10] sm:$0xff] }
 0x454   :  { %1097 = vmatmul.msk.bf16.gmra.mxu1 %vm73_vm2, %v1165_v30  ;;  %1093 = vmatmul.msk.bf16.gmra.mxu0 %vm73_vm2, %v1165_v30 }
 0x455   :  { %1227 = vpow2.f32 %v1141_v32  ;;  %v1166_v32 = vld [vmem:[%s1634_s0 + $0x18] sm:$0xff] }
 0x458   :  { %v422_v23 = vpop.f32.mrf.mxu2  ;;  %v435_v24 = vpop.f32.mrf.mxu3 }
 0x459   :  { %v1226_v25 = vpop.eup %1225 }
 0x45a   :  { %480 = vrot.lane.b32.xlu1 %v1226_v25, %s1299_s9 }
 0x45b   :  { %v1228_v33 = vpop.eup %1227 }
 0x45c   :  { %v445_v35 = vadd.f32 1.0, %v1228_v33 }
 0x45e   :  { %1229 = vrcp.f32 %v445_v35  ;;  %v458_v41 = vand.u32 2147483648, %v445_v35  ;;  %vm452_vm8 = vweird.f32 %v445_v35  ;;  %v456_v42 = vand.u32 2147483647, %v445_v35 }
 0x460   :  { %v459_v45 = vor.u32 1.1754944e-38, %v458_v41  ;;  %vm457_vm10 = vcmp.eq.f32.partialorder %v456_v42, 8.507059e+37 }
 0x464   :  { %v1230_v36 = vpop.eup %1229  ;;  %1098 = vmatmul.msk.bf16.gmra.mxu1 %vm73_vm2, %v1166_v32  ;;  %1094 = vmatmul.msk.bf16.gmra.mxu0 %vm73_vm2, %v1166_v32 }
 0x465   :  { %v448_v37 = vmul.f32 %v1230_v36, %v445_v35  ;;  %vm453_vm7 = vweird.f32 %v1230_v36 }
 0x466   :  { %vm454_vm9 = vmor %vm452_vm8, %vm453_vm7 }
 0x467   :  { %v449_v38 = vsub.f32 1.0, %v448_v37 }
 0x469   :  { %v450_v39 = vmul.f32 %v1230_v36, %v449_v38 }
 0x46b   :  { %v451_v40 = vadd.f32 %v1230_v36, %v450_v39 }
 0x46d   :  { %v455_v43 = vsel %vm454_vm9, %v1230_v36, %v451_v40 }
 0x46e   :  { %v460_v47 = vsel %vm457_vm10, %v459_v45, %v455_v43 }
 0x46f   :  { %v478_v49 = vmul.f32 %v460_v47, %v1483_v58 }
 0x4cc   :  { %v481_v46 = vpop.permute.xlu1 %480 }
 0x4cd   :  { %v483_v48 = vmul.f32 %v481_v46, %v460_v47 }
 0x4cf   :  { %485 = vrot.lane.b32.xlu2 %v483_v48, %s1299_s9 }
 0x529   :  { %v486_v50 = vpop.permute.xlu2 %485 }
 0x52a   :  { %v1508_v51 = vadd.f32 %v486_v50, %v478_v49 }
 0x52c   :  { %1231 = vtanh.f32 %v1508_v51 }
 0x52d   :  { %1233 = vpow2.f32 %v1142_v53 }
 0x532   :  { %v1232_v52 = vpop.eup %1231 }
 0x533   :  { %491 = vrot.lane.b32.xlu0 %v1232_v52, %s1299_s9  ;;  %v1234_v54 = vpop.eup %1233 }
 0x534   :  { %v446_v55 = vadd.f32 1.0, %v1234_v54 }
 0x536   :  { %1235 = vrcp.f32 %v446_v55  ;;  %v473_v58 = vand.u32 2147483648, %v446_v55  ;;  %vm467_vm12 = vweird.f32 %v446_v55  ;;  %v471_v62 = vand.u32 2147483647, %v446_v55 }
 0x538   :  { %v474_v0 = vor.u32 1.1754944e-38, %v473_v58  ;;  %vm472_vm14 = vcmp.eq.f32.partialorder %v471_v62, 8.507059e+37 }
 0x53c   :  { %v1236_v56 = vpop.eup %1235 }
 0x53d   :  { %v463_v57 = vmul.f32 %v1236_v56, %v446_v55  ;;  %vm468_vm11 = vweird.f32 %v1236_v56 }
 0x53e   :  { %vm469_vm13 = vmor %vm467_vm12, %vm468_vm11 }
 0x53f   :  { %v464_v59 = vsub.f32 1.0, %v463_v57 }
 0x541   :  { %v465_v60 = vmul.f32 %v1236_v56, %v464_v59 }
 0x543   :  { %v466_v61 = vadd.f32 %v1236_v56, %v465_v60 }
 0x545   :  { %v470_v63 = vsel %vm469_vm13, %v1236_v56, %v466_v61  ;;  %v139_v56 = vpop.f32.mrf.mxu1 }
 0x546   :  { %v475_v1 = vsel %vm472_vm14, %v474_v0, %v470_v63  ;;  %v140_v0 = vadd.f32 %v139_v56, %v1454_v34 }
 0x54d   :  { %v1547_v59 = vpop.f32.mrf.mxu1 }
 0x555   :  { %v1551_v61 = vpop.f32.mrf.mxu1 }
 0x55d   :  { %v1555_v62 = vpop.f32.mrf.mxu1 }
 0x5a5   :  { %v492_v2 = vpop.permute.xlu0 %491 }
 0x5a6   :  { %v494_v3 = vmul.f32 %v492_v2, %v475_v1 }
 0x5a8   :  { %v495_v5 = vpack.c.bf16 %v494_v3, %v494_v3 }
 0x5aa   :  { %497 = vst.msk [vmem:[#allocation5 + $0x8] sm:$0xf] %vm30_vm0, %v495_v5  ;;  %1143 = vmatmul.msk.bf16.vlgmr.msrb.gmra.mxu2 %vm32_vm3, %v495_v5  ;;  %1144 = vmatmul.msk.bf16.vlgmr.msrb.gmra.mxu3 %vm32_vm3, %v495_v5 }
 0x5ab   :  { %893 = vmatpush.bf16.msrb.mxu3 %v1344_v4  ;;  %880 = vmatpush.bf16.msrb.mxu2 %v1368_v12 }
 0x5af   :  { %894 = vmatpush.bf16.msrb.mxu3 %v1353_v7  ;;  %881 = vmatpush.bf16.msrb.mxu2 %v1386_v18  ;;  %v107_v18 = vpop.f32.mrf.mxu0 }
 0x5b3   :  { %895 = vmatpush.bf16.msrb.mxu3 %v1377_v15  ;;  %882 = vmatpush.bf16.msrb.mxu2 %v1401_v27  ;;  %v108_v15 = vadd.f32 %v107_v18, %v1459_v44 }
 0x5b7   :  { %896 = vmatpush.bf16.msrb.mxu3 %v1398_v26  ;;  %883 = vmatpush.bf16.msrb.mxu2 %v1415_v31  ;;  %v110_v55 = vpop.f32.mrf.mxu0 }
 0x5b8   :  { %v111_v63 = vadd.f32 %v110_v55, %v1459_v44 }
 0x5bf   :  { %v1545_v57 = vpop.f32.mrf.mxu0 }
 0x5c7   :  { %v1549_v60 = vpop.f32.mrf.mxu0 }
 0x5cf   :  { %v1553_v58 = vpop.f32.mrf.mxu0 }
 0x62d   :  { %v513_v9 = vpop.f32.mrf.mxu2  ;;  %v526_v10 = vpop.f32.mrf.mxu3 }
 0x62e   :  { %v531_v4 = vadd.f32 %v526_v10, %v137_v8  ;;  %v530_v27 = vadd.f32 %v513_v9, %v108_v15 }
 0x630   :  { %1237 = vtanh.f32 %v531_v4  ;;  %v1145_v13 = vmul.f32 -1.442695, %v530_v27  ;;  %v1146_v38 = vmul.f32 -1.442695, %v531_v4 }
 0x632   :  { %1239 = vpow2.f32 %v1145_v13 }
 0x635   :  { %v515_v12 = vpop.f32.mrf.mxu2  ;;  %v528_v11 = vpop.f32.mrf.mxu3 }
 0x636   :  { %v1238_v7 = vpop.eup %1237 }
 0x637   :  { %573 = vrot.lane.b32.xlu1 %v1238_v7, %s1299_s9 }
 0x638   :  { %v1240_v26 = vpop.eup %1239 }
 0x639   :  { %v538_v31 = vadd.f32 1.0, %v1240_v26 }
 0x63b   :  { %1241 = vrcp.f32 %v538_v31  ;;  %v551_v21 = vand.u32 2147483648, %v538_v31  ;;  %vm545_vm1 = vweird.f32 %v538_v31  ;;  %v549_v22 = vand.u32 2147483647, %v538_v31 }
 0x63d   :  { %v552_v24 = vor.u32 1.1754944e-38, %v551_v21  ;;  %vm550_vm5 = vcmp.eq.f32.partialorder %v549_v22, 8.507059e+37 }
 0x641   :  { %v1242_v14 = vpop.eup %1241 }
 0x642   :  { %v541_v16 = vmul.f32 %v1242_v14, %v538_v31  ;;  %vm546_vm15 = vweird.f32 %v1242_v14 }
 0x643   :  { %vm547_vm4 = vmor %vm545_vm1, %vm546_vm15 }
 0x644   :  { %v542_v17 = vsub.f32 1.0, %v541_v16 }
 0x646   :  { %v543_v19 = vmul.f32 %v1242_v14, %v542_v17 }
 0x648   :  { %v544_v20 = vadd.f32 %v1242_v14, %v543_v19 }
 0x64a   :  { %v548_v23 = vsel %vm547_vm4, %v1242_v14, %v544_v20 }
 0x64b   :  { %v553_v28 = vsel %vm550_vm5, %v552_v24, %v548_v23 }
 0x64c   :  { %v571_v33 = vmul.f32 %v553_v28, %v1508_v51 }
 0x6a9   :  { %v574_v25 = vpop.permute.xlu1 %573 }
 0x6aa   :  { %v576_v29 = vmul.f32 %v574_v25, %v553_v28 }
 0x6ac   :  { %578 = vrot.lane.b32.xlu2 %v576_v29, %s1299_s9 }
 0x706   :  { %v579_v35 = vpop.permute.xlu2 %578 }
 0x707   :  { %v1538_v36 = vadd.f32 %v579_v35, %v571_v33 }
 0x709   :  { %1243 = vtanh.f32 %v1538_v36 }
 0x70a   :  { %1245 = vpow2.f32 %v1146_v38 }
 0x70f   :  { %v1244_v37 = vpop.eup %1243 }
 0x710   :  { %584 = vrot.lane.b32.xlu0 %v1244_v37, %s1299_s9  ;;  %v1246_v39 = vpop.eup %1245 }
 0x711   :  { %v539_v40 = vadd.f32 1.0, %v1246_v39 }
 0x713   :  { %1247 = vrcp.f32 %v539_v40  ;;  %v566_v47 = vand.u32 2147483648, %v539_v40  ;;  %vm560_vm6 = vweird.f32 %v539_v40  ;;  %v564_v48 = vand.u32 2147483647, %v539_v40 }
 0x715   :  { %v567_v50 = vor.u32 1.1754944e-38, %v566_v47  ;;  %vm565_vm8 = vcmp.eq.f32.partialorder %v564_v48, 8.507059e+37 }
 0x719   :  { %v1248_v41 = vpop.eup %1247 }
 0x71a   :  { %v556_v42 = vmul.f32 %v1248_v41, %v539_v40  ;;  %vm561_vm2 = vweird.f32 %v1248_v41 }
 0x71b   :  { %vm562_vm7 = vmor %vm560_vm6, %vm561_vm2 }
 0x71c   :  { %v557_v43 = vsub.f32 1.0, %v556_v42 }
 0x71e   :  { %v558_v45 = vmul.f32 %v1248_v41, %v557_v43 }
 0x720   :  { %v559_v46 = vadd.f32 %v1248_v41, %v558_v45  ;;  %v142_v45 = vadd.f32 %v1547_v59, %v1454_v34 }
 0x722   :  { %v563_v49 = vsel %vm562_vm7, %v1248_v41, %v559_v46  ;;  %v113_v46 = vadd.f32 %v1545_v57, %v1459_v44 }
 0x723   :  { %v568_v51 = vsel %vm565_vm8, %v567_v50, %v563_v49 }
 0x782   :  { %v585_v52 = vpop.permute.xlu0 %584 }
 0x783   :  { %v587_v53 = vmul.f32 %v585_v52, %v568_v51 }
 0x785   :  { %v588_v54 = vpack.c.bf16 %v587_v53, %v587_v53 }
 0x787   :  { %590 = vst.msk [vmem:[#allocation5 + $0xc] sm:$0xf] %vm30_vm0, %v588_v54  ;;  %1147 = vmatmul.msk.bf16.vlgmr.msrb.gmra.mxu0 %vm32_vm3, %v588_v54  ;;  %1148 = vmatmul.msk.bf16.vlgmr.msrb.gmra.mxu1 %vm32_vm3, %v588_v54 }
 0x804   :  { %v606_v1 = vpop.f32.mrf.mxu0  ;;  %v619_v2 = vpop.f32.mrf.mxu1 }
 0x805   :  { %v623_v3 = vadd.f32 %v606_v1, %v111_v63  ;;  %v624_v5 = vadd.f32 %v619_v2, %v140_v0 }
 0x807   :  { %1249 = vtanh.f32 %v624_v5  ;;  %v1149_v10 = vmul.f32 -1.442695, %v623_v3  ;;  %v1150_v24 = vmul.f32 -1.442695, %v624_v5 }
 0x809   :  { %1251 = vpow2.f32 %v1149_v10 }
 0x80c   :  { %v608_v6 = vpop.f32.mrf.mxu0  ;;  %v621_v8 = vpop.f32.mrf.mxu1 }
 0x80d   :  { %v1250_v9 = vpop.eup %1249 }
 0x80e   :  { %666 = vrot.lane.b32.xlu1 %v1250_v9, %s1299_s9 }
 0x80f   :  { %v1252_v4 = vpop.eup %1251 }
 0x810   :  { %v631_v12 = vadd.f32 1.0, %v1252_v4 }
 0x812   :  { %1253 = vrcp.f32 %v631_v12  ;;  %v644_v13 = vand.u32 2147483648, %v631_v12  ;;  %vm638_vm10 = vweird.f32 %v631_v12  ;;  %v642_v26 = vand.u32 2147483647, %v631_v12 }
 0x814   :  { %v645_v14 = vor.u32 1.1754944e-38, %v644_v13  ;;  %vm643_vm12 = vcmp.eq.f32.partialorder %v642_v26, 8.507059e+37 }
 0x818   :  { %v1254_v11 = vpop.eup %1253 }
 0x819   :  { %v634_v7 = vmul.f32 %v1254_v11, %v631_v12  ;;  %vm639_vm9 = vweird.f32 %v1254_v11 }
 0x81a   :  { %vm640_vm11 = vmor %vm638_vm10, %vm639_vm9 }
 0x81b   :  { %v635_v18 = vsub.f32 1.0, %v634_v7 }
 0x81d   :  { %v636_v15 = vmul.f32 %v1254_v11, %v635_v18 }
 0x81f   :  { %v637_v27 = vadd.f32 %v1254_v11, %v636_v15 }
 0x821   :  { %v641_v31 = vsel %vm640_vm11, %v1254_v11, %v637_v27 }
 0x822   :  { %v646_v17 = vsel %vm643_vm12, %v645_v14, %v641_v31 }
 0x823   :  { %v664_v20 = vmul.f32 %v646_v17, %v1538_v36 }
 0x880   :  { %v667_v16 = vpop.permute.xlu1 %666 }
 0x881   :  { %v669_v19 = vmul.f32 %v667_v16, %v646_v17 }
 0x883   :  { %671 = vrot.lane.b32.xlu2 %v669_v19, %s1299_s9 }
 0x8dd   :  { %v672_v21 = vpop.permute.xlu2 %671 }
 0x8de   :  { %v674_v22 = vadd.f32 %v672_v21, %v664_v20 }
 0x8e0   :  { %1255 = vtanh.f32 %v674_v22 }
 0x8e1   :  { %1257 = vpow2.f32 %v1150_v24 }
 0x8e6   :  { %v1256_v23 = vpop.eup %1255 }
 0x8e7   :  { %677 = vrot.lane.b32.xlu0 %v1256_v23, %s1299_s9  ;;  %v1258_v25 = vpop.eup %1257 }
 0x8e8   :  { %v632_v28 = vadd.f32 1.0, %v1258_v25 }
 0x8ea   :  { %1259 = vrcp.f32 %v632_v28  ;;  %v659_v37 = vand.u32 2147483648, %v632_v28  ;;  %vm653_vm14 = vweird.f32 %v632_v28  ;;  %v657_v36 = vand.u32 2147483647, %v632_v28 }
 0x8ec   :  { %v660_v39 = vor.u32 1.1754944e-38, %v659_v37  ;;  %vm658_vm1 = vcmp.eq.f32.partialorder %v657_v36, 8.507059e+37 }
 0x8f0   :  { %v1260_v29 = vpop.eup %1259 }
 0x8f1   :  { %v649_v30 = vmul.f32 %v1260_v29, %v632_v28  ;;  %vm654_vm13 = vweird.f32 %v1260_v29  ;;  %v145_v28 = vadd.f32 %v1551_v61, %v1454_v34 }
 0x8f2   :  { %vm655_vm15 = vmor %vm653_vm14, %vm654_vm13 }
 0x8f3   :  { %v650_v32 = vsub.f32 1.0, %v649_v30 }
 0x8f5   :  { %v651_v33 = vmul.f32 %v1260_v29, %v650_v32 }
 0x8f7   :  { %v652_v35 = vadd.f32 %v1260_v29, %v651_v33 }
 0x8f9   :  { %v656_v38 = vsel %vm655_vm15, %v1260_v29, %v652_v35  ;;  %v116_v29 = vadd.f32 %v1549_v60, %v1459_v44 }
 0x8fa   :  { %v661_v40 = vsel %vm658_vm1, %v660_v39, %v656_v38 }
 0x959   :  { %v678_v41 = vpop.permute.xlu0 %677 }
 0x95a   :  { %v680_v42 = vmul.f32 %v678_v41, %v661_v40 }
 0x95c   :  { %v681_v43 = vpack.c.bf16 %v680_v42, %v680_v42 }
 0x95e   :  { %683 = vst.msk [vmem:[#allocation5 + $0x10] sm:$0xf] %vm30_vm0, %v681_v43  ;;  %1151 = vmatmul.msk.bf16.vlgmr.msra.gmra.mxu2 %vm32_vm3, %v681_v43  ;;  %1152 = vmatmul.msk.bf16.vlgmr.msra.gmra.mxu3 %vm32_vm3, %v681_v43 }
 0x9e1   :  { %v699_v47 = vpop.f32.mrf.mxu2  ;;  %v712_v48 = vpop.f32.mrf.mxu3 }
 0x9e2   :  { %v716_v49 = vadd.f32 %v699_v47, %v113_v46  ;;  %v717_v50 = vadd.f32 %v712_v48, %v142_v45 }
 0x9e4   :  { %1261 = vtanh.f32 %v717_v50  ;;  %v1153_v54 = vmul.f32 -1.442695, %v716_v49  ;;  %v1154_v18 = vmul.f32 -1.442695, %v717_v50 }
 0x9e6   :  { %1263 = vpow2.f32 %v1153_v54 }
 0x9e9   :  { %v701_v51 = vpop.f32.mrf.mxu2  ;;  %v714_v52 = vpop.f32.mrf.mxu3 }
 0x9ea   :  { %v1262_v53 = vpop.eup %1261 }
 0x9eb   :  { %759 = vrot.lane.b32.xlu1 %v1262_v53, %s1299_s9 }
 0x9ec   :  { %v1264_v55 = vpop.eup %1263 }
 0x9ed   :  { %v724_v56 = vadd.f32 1.0, %v1264_v55 }
 0x9ef   :  { %1265 = vrcp.f32 %v724_v56  ;;  %v737_v2 = vand.u32 2147483648, %v724_v56  ;;  %vm731_vm5 = vweird.f32 %v724_v56  ;;  %v735_v3 = vand.u32 2147483647, %v724_v56 }
 0x9f1   :  { %v738_v6 = vor.u32 1.1754944e-38, %v737_v2  ;;  %vm736_vm6 = vcmp.eq.f32.partialorder %v735_v3, 8.507059e+37 }
 0x9f5   :  { %v1266_v63 = vpop.eup %1265 }
 0x9f6   :  { %v727_v59 = vmul.f32 %v1266_v63, %v724_v56  ;;  %vm732_vm4 = vweird.f32 %v1266_v63 }
 0x9f7   :  { %vm733_vm2 = vmor %vm731_vm5, %vm732_vm4 }
 0x9f8   :  { %v728_v0 = vsub.f32 1.0, %v727_v59 }
 0x9fa   :  { %v729_v1 = vmul.f32 %v1266_v63, %v728_v0 }
 0x9fc   :  { %v730_v57 = vadd.f32 %v1266_v63, %v729_v1 }
 0x9fe   :  { %v734_v5 = vsel %vm733_vm2, %v1266_v63, %v730_v57 }
 0x9ff   :  { %v739_v9 = vsel %vm736_vm6, %v738_v6, %v734_v5 }
 0xa00   :  { %v757_v4 = vmul.f32 %v739_v9, %v674_v22 }
 0xa5d   :  { %v760_v8 = vpop.permute.xlu1 %759 }
 0xa5e   :  { %v762_v10 = vmul.f32 %v760_v8, %v739_v9 }
 0xa60   :  { %764 = vrot.lane.b32.xlu2 %v762_v10, %s1299_s9 }
 0xaba   :  { %v765_v12 = vpop.permute.xlu2 %764 }
 0xabb   :  { %v767_v11 = vadd.f32 %v765_v12, %v757_v4 }
 0xabd   :  { %1267 = vtanh.f32 %v767_v11 }
 0xabe   :  { %1269 = vpow2.f32 %v1154_v18  ;;  %v147_v18 = vadd.f32 %v1555_v62, %v1454_v34 }
 0xac3   :  { %v1268_v7 = vpop.eup %1267 }
 0xac4   :  { %770 = vrot.lane.b32.xlu0 %v1268_v7, %s1299_s9  ;;  %v1270_v15 = vpop.eup %1269 }
 0xac5   :  { %v725_v27 = vadd.f32 1.0, %v1270_v15 }
 0xac7   :  { %1271 = vrcp.f32 %v725_v27  ;;  %v752_v17 = vand.u32 2147483648, %v725_v27  ;;  %vm746_vm8 = vweird.f32 %v725_v27  ;;  %v750_v19 = vand.u32 2147483647, %v725_v27 }
 0xac9   :  { %v753_v21 = vor.u32 1.1754944e-38, %v752_v17  ;;  %vm751_vm10 = vcmp.eq.f32.partialorder %v750_v19, 8.507059e+37 }
 0xacd   :  { %v1272_v13 = vpop.eup %1271 }
 0xace   :  { %v742_v26 = vmul.f32 %v1272_v13, %v725_v27  ;;  %vm747_vm7 = vweird.f32 %v1272_v13 }
 0xacf   :  { %vm748_vm9 = vmor %vm746_vm8, %vm747_vm7 }
 0xad0   :  { %v743_v31 = vsub.f32 1.0, %v742_v26 }
 0xad2   :  { %v744_v14 = vmul.f32 %v1272_v13, %v743_v31 }
 0xad4   :  { %v745_v16 = vadd.f32 %v1272_v13, %v744_v14 }
 0xad6   :  { %v749_v20 = vsel %vm748_vm9, %v1272_v13, %v745_v16  ;;  %v118_v16 = vadd.f32 %v1553_v58, %v1459_v44 }
 0xad7   :  { %v754_v22 = vsel %vm751_vm10, %v753_v21, %v749_v20 }
 0xb36   :  { %v771_v23 = vpop.permute.xlu0 %770 }
 0xb37   :  { %v773_v24 = vmul.f32 %v771_v23, %v754_v22 }
 0xb39   :  { %v774_v25 = vpack.c.bf16 %v773_v24, %v773_v24 }
 0xb3b   :  { %776 = vst.msk [vmem:[#allocation5 + $0x14] sm:$0xf] %vm30_vm0, %v774_v25  ;;  %1155 = vmatmul.msk.bf16.vlgmr.msra.gmra.mxu0 %vm32_vm3, %v774_v25  ;;  %1156 = vmatmul.msk.bf16.vlgmr.msra.gmra.mxu1 %vm32_vm3, %v774_v25 }
 0xbb8   :  { %v792_v30 = vpop.f32.mrf.mxu0  ;;  %v805_v32 = vpop.f32.mrf.mxu1 }
 0xbb9   :  { %v809_v33 = vadd.f32 %v792_v30, %v116_v29  ;;  %v810_v35 = vadd.f32 %v805_v32, %v145_v28 }
 0xbbb   :  { %1273 = vtanh.f32 %v810_v35  ;;  %v1157_v39 = vmul.f32 -1.442695, %v809_v33  ;;  %v1158_v63 = vmul.f32 -1.442695, %v810_v35  ;;  %v11_v33 = vstv %s1637_s5  ;;  %v1176_v35 = vld [vmem:[#allocation5] sm:$0xff]  }
 0xbbc   :  { %12 = vst [vmem:[#allocation6] sm:$0x1] %v11_v33 }
 0xbbd   :  { %1275 = vpow2.f32 %v1157_v39 }
 0xbc0   :  { %v794_v37 = vpop.f32.mrf.mxu0  ;;  %v807_v36 = vpop.f32.mrf.mxu1 }
 0xbc1   :  { %v1274_v38 = vpop.eup %1273  ;;  %v1177_v37 = vunpack.c.l.bf16 %v1176_v35  ;;  %v1604_v36 = vld [vmem:[%s1636_s4] ss:$0 sm:$0xff] }
 0xbc2   :  { %852 = vrot.lane.b32.xlu1 %v1274_v38, %s1299_s9 }
 0xbc3   :  { %v1276_v40 = vpop.eup %1275  ;;  %v989_v38 = vmul.f32 %v1604_v36, %v1177_v37 }
 0xbc4   :  { %v817_v41 = vadd.f32 1.0, %v1276_v40  ;;  %v1200_v40 = vld [vmem:[#allocation6] ss:$0 sm:$0xff] }
 0xbc5   :  { %v997_v39 = vsel %vm32_vm3, %v989_v38, 0.0 }
 0xbc6   :  { %1277 = vrcp.f32 %v817_v41  ;;  %v830_v46 = vand.u32 2147483648, %v817_v41  ;;  %vm824_vm12 = vweird.f32 %v817_v41  ;;  %v828_v47 = vand.u32 2147483647, %v817_v41 }
 0xbc8   :  { %v831_v49 = vor.u32 1.1754944e-38, %v830_v46  ;;  %vm829_vm14 = vcmp.eq.f32.partialorder %v828_v47, 8.507059e+37  ;;  %v1192_v47 = vld [vmem:[#allocation5 + $0x10] sm:$0xff]  }
 0xbcc   :  { %v1278_v42 = vpop.eup %1277 }
 0xbcd   :  { %v820_v61 = vmul.f32 %v1278_v42, %v817_v41  ;;  %vm825_vm11 = vweird.f32 %v1278_v42 }
 0xbce   :  { %vm826_vm13 = vmor %vm824_vm12, %vm825_vm11 }
 0xbcf   :  { %v821_v43 = vsub.f32 1.0, %v820_v61 }
 0xbd1   :  { %v822_v45 = vmul.f32 %v1278_v42, %v821_v43 }
 0xbd3   :  { %v823_v60 = vadd.f32 %v1278_v42, %v822_v45  ;;  %v1191_v45 = vld [vmem:[#allocation5 + $0x8] sm:$0xff]  }
 0xbd5   :  { %v827_v48 = vsel %vm826_vm13, %v1278_v42, %v823_v60  ;;  %v1181_v60 = vunpack.c.l.bf16 %v1191_v45  ;;  %vm1058_vm13 = vcmask 1043459  }
 0xbd6   :  { %v832_v51 = vsel %vm829_vm14, %v831_v49, %v827_v48  ;;  %v1178_v48 = vunpack.c.h.bf16 %v1176_v35  ;;  %vm1060_vm14 = vcmask 1044484  }
 0xbd7   :  { %v850_v53 = vmul.f32 %v832_v51, %v767_v11  ;;  %v991_v46 = vmul.f32 %v1604_v36, %v1181_v60 }
 0xbd9   :  { %v1003_v49 = vsel %vm32_vm3, %v991_v46, 0.0 }
 0xc34   :  { %v853_v50 = vpop.permute.xlu1 %852 }
 0xc35   :  { %v855_v52 = vmul.f32 %v853_v50, %v832_v51  ;;  %v1185_v50 = vunpack.c.l.bf16 %v1192_v47  ;;  %v990_v51 = vmul.f32 %v1604_v36, %v1178_v48 }
 0xc37   :  { %857 = vrot.lane.b32.xlu2 %v855_v52, %s1299_s9  ;;  %v993_v52 = vmul.f32 %v1604_v36, %v1185_v50 }
 0xc91   :  { %v858_v54 = vpop.permute.xlu2 %857 }
 0xc92   :  { %v1582_v55 = vadd.f32 %v858_v54, %v850_v53  ;;  %v1000_v53 = vsel %vm32_vm3, %v990_v51, 0.0  ;;  %v1182_v54 = vunpack.c.h.bf16 %v1191_v45 }
 0xc94   :  { %1279 = vtanh.f32 %v1582_v55 }
 0xc95   :  { %1281 = vpow2.f32 %v1158_v63 }
 0xc9a   :  { %v1280_v56 = vpop.eup %1279 }
 0xc9b   :  { %863 = vrot.lane.b32.xlu0 %v1280_v56, %s1299_s9  ;;  %v1282_v59 = vpop.eup %1281  ;;  %v992_v56 = vmul.f32 %v1604_v36, %v1182_v54 }
 0xc9c   :  { %v818_v0 = vadd.f32 1.0, %v1282_v59  ;;  %v1186_v59 = vunpack.c.h.bf16 %v1192_v47 }
 0xc9d   :  { %v1006_v63 = vsel %vm32_vm3, %v992_v56, 0.0 }
 0xc9e   :  { %1283 = vrcp.f32 %v818_v0  ;;  %v845_v6 = vand.u32 2147483648, %v818_v0  ;;  %vm839_vm1 = vweird.f32 %v818_v0  ;;  %v843_v8 = vand.u32 2147483647, %v818_v0 }
 0xca0   :  { %v846_v10 = vor.u32 1.1754944e-38, %v845_v6  ;;  %vm844_vm5 = vcmp.eq.f32.partialorder %v843_v8, 8.507059e+37 }
 0xca4   :  { %v1284_v1 = vpop.eup %1283 }
 0xca5   :  { %v835_v57 = vmul.f32 %v1284_v1, %v818_v0  ;;  %vm840_vm15 = vweird.f32 %v1284_v1  ;;  %v994_v0 = vmul.f32 %v1604_v36, %v1186_v59 }
 0xca6   :  { %vm841_vm4 = vmor %vm839_vm1, %vm840_vm15  ;;  %vm1062_vm15 = vcmask 1045509   ;;  %vm1064_vm1 = vcmask 1046534  }
 0xca7   :  { %v836_v2 = vsub.f32 1.0, %v835_v57 }
 0xca9   :  { %v837_v3 = vmul.f32 %v1284_v1, %v836_v2 }
 0xcab   :  { %v838_v5 = vadd.f32 %v1284_v1, %v837_v3 }
 0xcad   :  { %v842_v9 = vsel %vm841_vm4, %v1284_v1, %v838_v5  ;;  %v1012_v1 = vsel %vm32_vm3, %v994_v0, 0.0  ;;  %vm1066_vm4 = vcmask 1047559  }
 0xcae   :  { %v847_v4 = vsel %vm844_vm5, %v846_v10, %v842_v9  ;;  %vm1069_vm5 = vcmask 64512  }
 0xd0d   :  { %v864_v12 = vpop.permute.xlu0 %863 }
 0xd0e   :  { %v866_v11 = vmul.f32 %v864_v12, %v847_v4 }
 0xd10   :  { %v867_v7 = vpack.c.bf16 %v866_v11, %v866_v11 }
 0xd12   :  { %869 = vst.msk [vmem:[#allocation5 + $0x18] sm:$0xf] %vm30_vm0, %v867_v7  ;;  %1159 = vmatmul.msk.bf16.vlgmr.msrb.gmra.mxu2 %vm32_vm3, %v867_v7  ;;  %1160 = vmatmul.msk.bf16.vlgmr.msrb.gmra.mxu3 %vm32_vm3, %v867_v7 }
 0xd95   :  { %v885_v15 = vpop.f32.mrf.mxu2  ;;  %v898_v27 = vpop.f32.mrf.mxu3 }
 0xd96   :  { %v1591_v13 = vadd.f32 %v898_v27, %v147_v18  ;;  %v902_v17 = vadd.f32 %v885_v15, %v118_v16 }
 0xd98   :  { %1285 = vtanh.f32 %v1591_v13  ;;  %v1161_v19 = vmul.f32 -1.442695, %v902_v17  ;;  %v1162_v57 = vmul.f32 -1.442695, %v1591_v13 }
 0xd9a   :  { %1287 = vpow2.f32 %v1161_v19 }
 0xd9d   :  { %v887_v26 = vpop.f32.mrf.mxu2  ;;  %v900_v31 = vpop.f32.mrf.mxu3 }
 0xd9e   :  { %v1286_v14 = vpop.eup %1285 }
 0xd9f   :  { %945 = vrot.lane.b32.xlu1 %v1286_v14, %s1299_s9 }
 0xda0   :  { %v1288_v20 = vpop.eup %1287 }
 0xda1   :  { %v910_v21 = vadd.f32 1.0, %v1288_v20 }
 0xda3   :  { %1289 = vrcp.f32 %v910_v21  ;;  %v923_v25 = vand.u32 2147483648, %v910_v21  ;;  %vm917_vm6 = vweird.f32 %v910_v21  ;;  %v921_v28 = vand.u32 2147483647, %v910_v21 }
 0xda5   :  { %v924_v30 = vor.u32 1.1754944e-38, %v923_v25  ;;  %vm922_vm8 = vcmp.eq.f32.partialorder %v921_v28, 8.507059e+37 }
 0xda9   :  { %v1290_v34 = vpop.eup %1289 }
 0xdaa   :  { %v913_v62 = vmul.f32 %v1290_v34, %v910_v21  ;;  %vm918_vm2 = vweird.f32 %v1290_v34 }
 0xdab   :  { %vm919_vm7 = vmor %vm917_vm6, %vm918_vm2 }
 0xdac   :  { %v914_v22 = vsub.f32 1.0, %v913_v62 }
 0xdae   :  { %v915_v23 = vmul.f32 %v1290_v34, %v914_v22 }
 0xdb0   :  { %v916_v24 = vadd.f32 %v1290_v34, %v915_v23 }
 0xdb2   :  { %v920_v29 = vsel %vm919_vm7, %v1290_v34, %v916_v24  ;;  %v1044_v24 = vlaneseq }
 0xdb3   :  { %v925_v58 = vsel %vm922_vm8, %v924_v30, %v920_v29 }
 0xdb4   :  { %v943_v41 = vmul.f32 %v925_v58, %v1582_v55  ;;  %v1009_v55 = vsel %vm32_vm3, %v993_v52, 0.0  ;;  %v1045_v29 = vand.u32 127, %v1044_v24 }
 0xe11   :  { %v946_v44 = vpop.permute.xlu1 %945 }
 0xe12   :  { %v948_v32 = vmul.f32 %v946_v44, %v925_v58 }
 0xe14   :  { %950 = vrot.lane.b32.xlu2 %v948_v32, %s1299_s9 }
 0xe3d   :  { %998 = vadd.xlane.f32.xlu2 %v997_v39 }
 0xe55   :  { %1025 = vperm.xlu2 %1197, %v1200_v40  }
 0xe6e   :  { %v951_v42 = vpop.permute.xlu2 %950 }
 0xe6f   :  { %v953_v61 = vadd.f32 %v951_v42, %v943_v41 }
 0xe71   :  { %1291 = vtanh.f32 %v953_v61  ;;  %965 = vrot.lane.b32.xlu1 %v953_v61, %s1299_s9 }
 0xe72   :  { %1293 = vpow2.f32 %v1162_v57 }
 0xe77   :  { %v1292_v43 = vpop.eup %1291 }
 0xe78   :  { %956 = vrot.lane.b32.xlu0 %v1292_v43, %s1299_s9  ;;  %v1294_v2 = vpop.eup %1293 }
 0xe79   :  { %v911_v3 = vadd.f32 1.0, %v1294_v2 }
 0xe7b   :  { %1295 = vrcp.f32 %v911_v3  ;;  %v938_v12 = vand.u32 2147483648, %v911_v3  ;;  %vm932_vm10 = vweird.f32 %v911_v3  ;;  %v936_v11 = vand.u32 2147483647, %v911_v3 }
 0xe7d   :  { %v939_v18 = vor.u32 1.1754944e-38, %v938_v12  ;;  %vm937_vm12 = vcmp.eq.f32.partialorder %v936_v11, 8.507059e+37 }
 0xe81   :  { %v1296_v5 = vpop.eup %1295 }
 0xe82   :  { %v928_v6 = vmul.f32 %v1296_v5, %v911_v3  ;;  %vm933_vm9 = vweird.f32 %v1296_v5 }
 0xe83   :  { %vm934_vm11 = vmor %vm932_vm10, %vm933_vm9 }
 0xe84   :  { %v929_v8 = vsub.f32 1.0, %v928_v6 }
 0xe86   :  { %v930_v9 = vmul.f32 %v1296_v5, %v929_v8 }
 0xe88   :  { %v931_v4 = vadd.f32 %v1296_v5, %v930_v9 }
 0xe8a   :  { %v935_v7 = vsel %vm934_vm11, %v1296_v5, %v931_v4 }
 0xe8b   :  { %v940_v15 = vsel %vm937_vm12, %v939_v18, %v935_v7 }
 0xe9b   :  { %1004 = vadd.xlane.f32.xlu1 %v1003_v49 }
 0xea2   :  { %1001 = vadd.xlane.f32.xlu0 %v1000_v53 }
 0xea3   :  { %1010 = vadd.xlane.f32.xlu1 %v1009_v55 }
 0xeaa   :  { %1007 = vadd.xlane.f32.xlu0 %v1006_v63 }
 0xeb0   :  { %v999_v62 = vpop.xlane.xlu2 %998 }
 0xeb2   :  { %1013 = vadd.xlane.f32.xlu0 %v1012_v1 }
 0xeb8   :  { %v1026_v25 = vpop.permute.xlu2 %1025 }
 0xeb9   :  { %v1028_v30 = vadd.f32 %v1026_v25, %v999_v62 }
 0xebb   :  { %v1046_v37 = vperm.slane %v1028_v30, %v1045_v29 }
 0xee3   :  { %v966_v10 = vpop.permute.xlu1 %965 }
 0xee4   :  { %968 = vst.msk [vmem:[#allocation3] sm:$0xff] %vm32_vm3, %v966_v10 }
 0xeea   :  { %v957_v27 = vpop.permute.xlu0 %956 }
 0xeeb   :  { %v959_v13 = vmul.f32 %v957_v27, %v940_v15 }
 0xeed   :  { %v960_v26 = vpack.c.bf16 %v959_v13, %v959_v13 }
 0xeef   :  { %962 = vst.msk [vmem:[#allocation5 + $0x1c] sm:$0xf] %vm30_vm0, %v960_v26 }
 0xef0   :  { %963 = vst.msk [vmem:[#allocation2] sm:$0xf] %vm30_vm0, %v960_v26  ;;  %vm1054_vm0 = vcmask 1041409  }
 0xef6   :  { %v1193_v31 = vld [vmem:[#allocation5 + $0x18] sm:$0xff]  }
 0xef7   :  { %v1189_v14 = vunpack.c.l.bf16 %v1193_v31  ;;  %v1190_v16 = vunpack.c.h.bf16 %v1193_v31 }
 0xef9   :  { %v995_v17 = vmul.f32 %v1604_v36, %v1189_v14  ;;  %v996_v19 = vmul.f32 %v1604_v36, %v1190_v16 }
 0xefb   :  { %v1015_v20 = vsel %vm32_vm3, %v995_v17, 0.0  ;;  %v1018_v21 = vsel %vm32_vm3, %v996_v19, 0.0  ;;  %vm1056_vm3 = vcmask 1042434  }
 0xefc   :  { %1016 = vadd.xlane.f32.xlu1 %v1015_v20  ;;  %1019 = vadd.xlane.f32.xlu2 %v1018_v21 }
 0xf0e   :  { %v1005_v22 = vpop.xlane.xlu1 %1004 }
 0xf0f   :  { %v1030_v33 = vadd.f32 %v1026_v25, %v1005_v22 }
 0xf11   :  { %v1048_v40 = vperm.slane %v1030_v33, %v1045_v29 }
 0xf15   :  { %v1002_v34 = vpop.xlane.xlu0 %1001 }
 0xf16   :  { %v1029_v28 = vadd.f32 %v1026_v25, %v1002_v34  ;;  %v1011_v58 = vpop.xlane.xlu1 %1010 }
 0xf17   :  { %v1032_v41 = vadd.f32 %v1026_v25, %v1011_v58 }
 0xf18   :  { %v1047_v44 = vperm.slane %v1029_v28, %v1045_v29 }
 0xf19   :  { %v1050_v46 = vperm.slane %v1032_v41, %v1045_v29 }
 0xf1a   :  { %v1055_v36 = vsel %vm1054_vm0, %v1047_v44, %v1046_v37 }
 0xf1b   :  { %v1057_v42 = vsel %vm1056_vm3, %v1048_v40, %v1055_v36 }
 0xf1d   :  { %v1008_v23 = vpop.xlane.xlu0 %1007 }
 0xf1e   :  { %v1031_v32 = vadd.f32 %v1026_v25, %v1008_v23 }
 0xf20   :  { %v1049_v38 = vperm.slane %v1031_v32, %v1045_v29 }
 0xf22   :  { %v1059_v61 = vsel %vm1058_vm13, %v1049_v38, %v1057_v42 }
 0xf23   :  { %v1061_v49 = vsel %vm1060_vm14, %v1050_v46, %v1059_v61 }
 0xf25   :  { %v1014_v35 = vpop.xlane.xlu0 %1013 }
 0xf26   :  { %v1033_v39 = vadd.f32 %v1026_v25, %v1014_v35 }
 0xf28   :  { %v1051_v43 = vperm.slane %v1033_v39, %v1045_v29 }
 0xf2a   :  { %v1063_v52 = vsel %vm1062_vm15, %v1051_v43, %v1061_v49 }
 0xf6f   :  { %v1017_v45 = vpop.xlane.xlu1 %1016  ;;  %v1020_v60 = vpop.xlane.xlu2 %1019 }
 0xf70   :  { %v1034_v47 = vadd.f32 %v1026_v25, %v1017_v45  ;;  %v1035_v48 = vadd.f32 %v1026_v25, %v1020_v60 }
 0xf72   :  { %v1052_v50 = vperm.slane %v1034_v47, %v1045_v29  ;;  %v1053_v51 = vperm.slane %v1035_v48, %v1045_v29 }
 0xf74   :  { %v1065_v53 = vsel %vm1064_vm1, %v1052_v50, %v1063_v52 }
 0xf75   :  { %v1067_v54 = vsel %vm1066_vm4, %v1053_v51, %v1065_v53 }
 0xf76   :  { %1070 = vst.msk [vmem:[%s1638_s6] sm:$0xff] %vm1069_vm5, %v1067_v54 }

</bundles_post_ra>
